<compile_context>
chip_gen: v7x
topology: tpu7x:2x2x1
jax: 0.10.0
libtpu: 0.0.40
codegen_flags: <defaults>
</compile_context>

<pallas_src>
import functools

import jax
import jax.numpy as jnp
from jax import lax
from jax.experimental import pallas as pl
from jax.experimental.pallas import tpu as pltpu

NEG_BIG = 1e9


def head_prob_encoder_kernel(
    x_ref, vrow_ref, vcol_ref, wf_ref, wv_ref, out_ref, *,
    n_head, d_model, n_iter,
    damping_H, damping_Z, stepsize_H, stepsize_Z, regularize_H, regularize_Z):
    """One batch element per grid step; the whole n_iter fixed-point loop runs in-kernel."""
    f32 = jnp.float32
    H, d = n_head, d_model
    unary = x_ref[0]                    # (L, d)     unary potentials
    vrow = vrow_ref[0]                  # (L, 1)     1.0 = valid token (row view)
    vcol = vcol_ref[0]                  # (1, L)     1.0 = valid token (col view)
    wf = wf_ref[...]                    # (d, 2*H*d) wf[a, (k,c,b)] = ternary[k,a,b,c]
    wv = wv_ref[...]                    # (d, 2*H*d) wv[b, (k,c,a)] = ternary[k,a,b,c]
    L = unary.shape[0]
    HL = H * L

    # ---- masks built in-kernel from iota + valid (no mask DMA) --------------
    row2 = lax.broadcasted_iota(jnp.int32, (L, L), 0)
    i_flat = jnp.concatenate([row2] * H, axis=0)                   # (H*L, L): i of the (head,i) row
    col_flat = lax.broadcasted_iota(jnp.int32, (HL, L), 1)         # (H*L, L): j
    upper = col_flat > i_flat                                      # j > i  (dist k=0)
    lower = col_flat < i_flat                                      # j < i  (dist k=1)
    diag_big = (col_flat == i_flat).astype(f32) * NEG_BIG          # (H*L, L)
    pair_valid = jnp.concatenate([vrow * vcol] * H, axis=0)        # (H*L, L)
    invalid = pair_valid < 0.5

    hscale = (1.0 - damping_H) / regularize_H * d
    zscale = (1.0 - damping_Z) / regularize_Z

    def softmax_last(x):
        m = jnp.max(x, axis=-1, keepdims=True)
        e = jnp.exp(x - m)
        return e * pl.reciprocal(jnp.sum(e, axis=-1, keepdims=True), approx=True)

    def mask_h(qh):
        # reference order: subtract 1e9 on the diagonal, then hard-set invalid pairs
        return jnp.where(invalid, -NEG_BIG, qh - diag_big)

    # q_h kept flat as (H*L, L): row = (head, i), col = j.
    q_z = unary * vrow
    q_h = mask_h(jnp.ones((HL, L), f32))
    cache_qh = q_h
    cache_norm_qz = q_z          # placeholders; never read in iteration 0
    cache_norm_qh = q_h

    # n_iter is small (default 4): static unroll == fori_loop(unroll=True), which
    # is the fast form for short fixed trip-counts on TPU.
    for it in range(n_iter):
        cache_qz = q_z
        if it == 0:
            qz_n = softmax_last(q_z)
        else:
            qz_n = (1.0 - stepsize_Z) * cache_norm_qz + stepsize_Z * softmax_last(q_z)
        cache_norm_qz = qz_n
        qz_m = qz_n * vrow                                          # (L, d)

        # ---- second_order_message_F: 2 fused matmuls -------------------------
        t = jnp.dot(qz_m, wf, preferred_element_type=f32)           # (L, 2*H*d), cols (k,c,b)
        t_stk = jnp.concatenate(
            [t[:, x * d:(x + 1) * d] for x in range(2 * H)], axis=0)    # (2*H*L, d), rows (k,c,i)
        m_stk = lax.dot_general(t_stk, qz_m, (((1,), (1,)), ((), ())),
                                preferred_element_type=f32)         # (2*H*L, L)
        m0 = m_stk[:HL]                                             # k=0 blocks (c,i)
        m1 = m_stk[HL:]                                             # k=1 blocks (c,i)
        f_msg = jnp.where(upper, m0, jnp.where(lower, m1, 0.0))     # (H*L, L)

        q_h = mask_h(cache_qh * damping_H + f_msg * hscale)
        cache_qh = q_h
        if it == 0:
            qh_n = softmax_last(q_h)
        else:
            qh_n = (1.0 - stepsize_H) * cache_norm_qh + stepsize_H * softmax_last(q_h)
        cache_norm_qh = qh_n
        # dropout_h: p = 0 -> identity

        # ---- second_order_message_G (both directions): 2 fused matmuls -------
        # per-head transpose of normalized q_h, computed once and reused
        qh_t = jnp.concatenate(
            [qh_n[c * L:(c + 1) * L, :].T for c in range(H)], axis=0)   # (H*L, L)
        p_all = jnp.concatenate(
            [jnp.where(lower, qh_t, 0.0),    # pairs ternary[0,a,b,c]
             jnp.where(upper, qh_t, 0.0),    # pairs ternary[1,a,b,c]
             jnp.where(upper, qh_n, 0.0),    # pairs ternary[0,b,a,c]
             jnp.where(lower, qh_n, 0.0)],   # pairs ternary[1,b,a,c]
            axis=0)                                                  # (4*H*L, L)
        vw = jnp.dot(qz_m, wv, preferred_element_type=f32)           # (L, 2*H*d), cols (k,c,a)
        v1 = jnp.concatenate(
            [vw[:, x * d:(x + 1) * d] for x in range(2 * H)], axis=0)   # (2*H*L, d)
        v_all = jnp.concatenate([v1, t_stk], axis=0)                 # (4*H*L, d)  (t_stk reused)
        g_msg = jnp.dot(p_all.T, v_all, preferred_element_type=f32)  # (L, d)

        q_z = cache_qz * damping_Z + (unary + g_msg) * zscale
        # dropout_z: p = 0 -> identity

    out_ref[0] = q_z.astype(out_ref.dtype)


def head_prob_encoder(x, mask, ternary, *, n_iter=4,
                      damping_H=0.0, damping_Z=0.0,
                      stepsize_H=1.0, stepsize_Z=1.0,
                      regularize_H=1.0, regularize_Z=1.0):
    """Wrapper: ternary re-layout + valid vectors + pallas_call."""
    B, L, d = x.shape
    K, _, _, H = ternary.shape
    assert K == 2, "only dists='' (K=2) is implemented"
    f32 = jnp.float32

    valid = (mask != 0).astype(f32)
    vrow = valid[:, :, None]                                            # (B, L, 1)
    vcol = valid[:, None, :]                                            # (B, 1, L)
    tern = ternary.astype(f32)
    # wf[a, (k,c,b)] = ternary[k,a,b,c]   (F message, first contraction)
    wf = jnp.transpose(tern, (1, 0, 3, 2)).reshape(d, 2 * H * d)
    # wv[b, (k,c,a)] = ternary[k,a,b,c]   (G message, value projection)
    wv = jnp.transpose(tern, (2, 0, 3, 1)).reshape(d, 2 * H * d)

    kern = functools.partial(
        head_prob_encoder_kernel,
        n_head=H, d_model=d, n_iter=n_iter,
        damping_H=damping_H, damping_Z=damping_Z,
        stepsize_H=stepsize_H, stepsize_Z=stepsize_Z,
        regularize_H=regularize_H, regularize_Z=regularize_Z)

    flops_iter = 2 * (L * d * 2 * H * d        # t
                      + 2 * H * L * d * L      # m_stk
                      + L * d * 2 * H * d      # vw
                      + L * 4 * H * L * d)     # g
    cost = pl.CostEstimate(
        flops=int(B * n_iter * flops_iter),
        transcendentals=int(B * n_iter * (H * L * L + L * d)),
        bytes_accessed=int(4 * (2 * x.size + vrow.size + vcol.size + wf.size + wv.size)))

    return pl.pallas_call(
        kern,
        out_shape=jax.ShapeDtypeStruct((B, L, d), f32),
        grid=(B,),
        in_specs=[
            pl.BlockSpec((1, L, d), lambda b: (b, 0, 0)),              # x
            pl.BlockSpec((1, L, 1), lambda b: (b, 0, 0)),              # valid (row view)
            pl.BlockSpec((1, 1, L), lambda b: (b, 0, 0)),              # valid (col view)
            pl.BlockSpec((d, 2 * H * d), lambda b: (0, 0)),            # wf (shared)
            pl.BlockSpec((d, 2 * H * d), lambda b: (0, 0)),            # wv (shared)
        ],
        out_specs=pl.BlockSpec((1, L, d), lambda b: (b, 0, 0)),
        compiler_params=pltpu.CompilerParams(
            dimension_semantics=("parallel",),
            vmem_limit_bytes=48 * 1024 * 1024),
        cost_estimate=cost,
    )(x.astype(f32), vrow, vcol, wf, wv)


def reference_forward(x, mask, ternary, *, n_iter=4,
                      damping_H=0.0, damping_Z=0.0,
                      stepsize_H=1.0, stepsize_Z=1.0,
                      regularize_H=1.0, regularize_Z=1.0):
    """Pure-JAX transcription of the PyTorch forward (for correctness checking)."""
    B, L, d = x.shape
    H = ternary.shape[-1]
    f32 = jnp.float32
    valid = (mask != 0)
    valid1 = valid[:, :, None].astype(f32)
    invalid2 = ~(valid[:, :, None] & valid[:, None, :])
    invalid2 = jnp.broadcast_to(invalid2[:, None], (B, H, L, L))
    dist0 = jnp.triu(jnp.ones((L, L), f32), 1)
    distmask = jnp.stack([dist0, dist0.T], axis=0)
    eye = jnp.eye(L, dtype=f32)
    softmax = lambda v: jax.nn.softmax(v, axis=-1)

    unary = x.astype(f32)
    q_z = unary * valid1
    q_h = jnp.ones((B, H, L, L), f32) - eye * NEG_BIG
    q_h = jnp.where(invalid2, -NEG_BIG, q_h)
    cache_qh = q_h
    cache_norm_qz, cache_norm_qh = softmax(q_z), softmax(q_h)
    for it in range(n_iter):
        cache_qz = q_z
        q_z = softmax(q_z) if it == 0 else (1 - stepsize_Z) * cache_norm_qz + stepsize_Z * softmax(q_z)
        cache_norm_qz = q_z
        q_z = q_z * valid1
        F = jnp.einsum('zia,zjb,kabc,kij->zcij', q_z, q_z, ternary, distmask)
        q_h = cache_qh * damping_H + F * (1 - damping_H) / regularize_H * d
        q_h = q_h - eye * NEG_BIG
        q_h = jnp.where(invalid2, -NEG_BIG, q_h)
        cache_qh = q_h
        q_h = softmax(q_h) if it == 0 else (1 - stepsize_H) * cache_norm_qh + stepsize_H * softmax(q_h)
        cache_norm_qh = q_h
        G = jnp.einsum('zjb,zcij,kabc,kij->zia', q_z, q_h, ternary, distmask)
        G = G + jnp.einsum('zjb,zcji,kbac,kji->zia', q_z, q_h, ternary, distmask)
        q_z = cache_qz * damping_Z + (unary + G) * (1 - damping_Z) / regularize_Z
    return q_z


if __name__ == "__main__":
    # Small, module-consistent shapes: batch=2, seq=8, d_model=32, n_head=4, n_iter=4.
    B, L, D, H = 2, 8, 32, 4
    key = jax.random.PRNGKey(0)
    kx, kt = jax.random.split(key)
    x = jax.random.normal(kx, (B, L, D), dtype=jnp.float32)
    mask = jnp.array([[1] * L, [1] * (L - 2) + [0] * 2], dtype=jnp.int32)
    # ternary parameter: (2*(len(dists)+1)=2, d_model, d_model, n_head), normal std=1
    ternary = jax.random.normal(kt, (2, D, D, H), dtype=jnp.float32)

    out = head_prob_encoder(x, mask, ternary)
    out = jax.block_until_ready(out)

    # Correctness check against a pure-JAX transcription of the PyTorch forward.
    with jax.default_matmul_precision('highest'):
        ref = jax.block_until_ready(reference_forward(x, mask, ternary))
    assert out.shape == (B, L, D) and out.dtype == jnp.float32
    assert jnp.allclose(out, ref, rtol=5e-2, atol=5e-2), \
        f"max abs diff {jnp.max(jnp.abs(out - ref))}"

    # TODO(synk): dropout (p=0 -> identity), DEBUG/DRAW recorder branches, output_prob,
    # use_td ('uv:'/'uvw:') decompositions, norm='relu' and the optional use_projection
    # MLP are disabled by default in the module and not translated.
    print("KERNEL_OK")
</pallas_src>

<mosaic_0001>
module attributes {stable_mosaic.version = 11 : i64} {
  func.func @head_prob_encoder_kernel(%arg0: i32, %arg1: memref<1x8x32xf32, #tpu.memory_space<vmem>>, %arg2: memref<1x8x1xf32, #tpu.memory_space<vmem>>, %arg3: memref<1x1x8xf32, #tpu.memory_space<vmem>>, %arg4: memref<32x256xf32, #tpu.memory_space<vmem>>, %arg5: memref<32x256xf32, #tpu.memory_space<vmem>>, %arg6: memref<1x8x32xf32, #tpu.memory_space<vmem>>) attributes {dimension_semantics = [#tpu.dimension_semantics<parallel>], iteration_bounds = array<i64: 2>, scalar_prefetch = 0 : i64, scratch_operands = 0 : i64, tpu.core_type = #tpu.core_type<tc>, window_params = [{transform_indices = @transform_0, window_bounds = array<i64: 1, 8, 32>}, {transform_indices = @transform_1, window_bounds = array<i64: 1, 8, 1>}, {transform_indices = @transform_2, window_bounds = array<i64: 1, 1, 8>}, {pipeline_mode = #tpu.pipeline_mode<synchronous>, transform_indices = @transform_3, window_bounds = array<i64: 32, 256>}, {pipeline_mode = #tpu.pipeline_mode<synchronous>, transform_indices = @transform_4, window_bounds = array<i64: 32, 256>}, {transform_indices = @transform_5, window_bounds = array<i64: 1, 8, 32>}]} {
    %c0 = arith.constant 0 : index
    %c0_0 = arith.constant 0 : index
    %c0_1 = arith.constant 0 : index
    %0 = vector.load %arg1[%c0, %c0_0, %c0_1] : memref<1x8x32xf32, #tpu.memory_space<vmem>>, vector<1x8x32xf32>
    %1 = vector.shape_cast %0 : vector<1x8x32xf32> to vector<8x32xf32>
    %c0_2 = arith.constant 0 : index
    %c0_3 = arith.constant 0 : index
    %c0_4 = arith.constant 0 : index
    %2 = vector.load %arg2[%c0_2, %c0_3, %c0_4] : memref<1x8x1xf32, #tpu.memory_space<vmem>>, vector<1x8x1xf32>
    %3 = vector.shape_cast %2 : vector<1x8x1xf32> to vector<8x1xf32>
    %c0_5 = arith.constant 0 : index
    %c0_6 = arith.constant 0 : index
    %c0_7 = arith.constant 0 : index
    %4 = vector.load %arg3[%c0_5, %c0_6, %c0_7] : memref<1x1x8xf32, #tpu.memory_space<vmem>>, vector<1x1x8xf32>
    %5 = vector.shape_cast %4 : vector<1x1x8xf32> to vector<1x8xf32>
    %c0_8 = arith.constant 0 : index
    %c0_9 = arith.constant 0 : index
    %6 = vector.load %arg4[%c0_8, %c0_9] : memref<32x256xf32, #tpu.memory_space<vmem>>, vector<32x256xf32>
    %c0_10 = arith.constant 0 : index
    %c0_11 = arith.constant 0 : index
    %7 = vector.load %arg5[%c0_10, %c0_11] : memref<32x256xf32, #tpu.memory_space<vmem>>, vector<32x256xf32>
    %8 = tpu.iota {dimensions = array<i32: 0>} : vector<8x8xi32>
    %9 = tpu.concatenate %8, %8, %8, %8 in 0 : vector<8x8xi32>, vector<8x8xi32>, vector<8x8xi32>, vector<8x8xi32> -> vector<32x8xi32>
    %10 = tpu.iota {dimensions = array<i32: 1>} : vector<32x8xi32>
    %11 = arith.cmpi sgt, %10, %9 : vector<32x8xi32>
    %12 = arith.cmpi slt, %10, %9 : vector<32x8xi32>
    %13 = arith.cmpi eq, %10, %9 : vector<32x8xi32>
    %14 = arith.extui %13 : vector<32x8xi1> to vector<32x8xi32>
    %15 = arith.sitofp %14 : vector<32x8xi32> to vector<32x8xf32>
    %cst = arith.constant 1.000000e+09 : f32
    %16 = vector.broadcast %cst : f32 to vector<32x8xf32>
    %17 = arith.mulf %15, %16 : vector<32x8xf32>
    %18 = vector.broadcast %3 : vector<8x1xf32> to vector<8x8xf32>
    %19 = vector.broadcast %5 : vector<1x8xf32> to vector<8x8xf32>
    %20 = arith.mulf %18, %19 : vector<8x8xf32>
    %21 = tpu.concatenate %20, %20, %20, %20 in 0 : vector<8x8xf32>, vector<8x8xf32>, vector<8x8xf32>, vector<8x8xf32> -> vector<32x8xf32>
    %cst_12 = arith.constant 5.000000e-01 : f32
    %22 = vector.broadcast %cst_12 : f32 to vector<32x8xf32>
    %23 = arith.cmpf olt, %21, %22 : vector<32x8xf32>
    %24 = vector.broadcast %3 : vector<8x1xf32> to vector<8x32xf32>
    %25 = arith.mulf %1, %24 : vector<8x32xf32>
    %cst_13 = arith.constant 1.000000e+00 : f32
    %26 = vector.broadcast %cst_13 : f32 to vector<32x8xf32>
    %27 = arith.subf %26, %17 : vector<32x8xf32>
    %cst_14 = arith.constant -1.000000e+09 : f32
    %28 = vector.broadcast %cst_14 : f32 to vector<32x8xf32>
    %29 = arith.select %23, %28, %27 : vector<32x8xi1>, vector<32x8xf32>
    %cst_15 = arith.constant dense<0xFF800000> : vector<8xf32>
    %30 = vector.multi_reduction <maximumf>, %25, %cst_15 [1] : vector<8x32xf32> to vector<8xf32>
    %31 = vector.shape_cast %30 : vector<8xf32> to vector<8x1xf32>
    %32 = vector.broadcast %31 : vector<8x1xf32> to vector<8x32xf32>
    %33 = arith.subf %25, %32 : vector<8x32xf32>
    %34 = math.exp %33 : vector<8x32xf32>
    %cst_16 = arith.constant dense<0.000000e+00> : vector<8xf32>
    %35 = vector.multi_reduction <add>, %34, %cst_16 [1] : vector<8x32xf32> to vector<8xf32>
    %36 = vector.shape_cast %35 : vector<8xf32> to vector<8x1xf32>
    %37 = tpu.reciprocal %36 {approx = true} : vector<8x1xf32> -> vector<8x1xf32>
    %38 = vector.broadcast %37 : vector<8x1xf32> to vector<8x32xf32>
    %39 = arith.mulf %34, %38 : vector<8x32xf32>
    %40 = vector.broadcast %3 : vector<8x1xf32> to vector<8x32xf32>
    %41 = arith.mulf %39, %40 : vector<8x32xf32>
    %cst_17 = arith.constant dense<0.000000e+00> : vector<8x256xf32>
    %42 = tpu.matmul %41, %6, %cst_17 {dimension_numbers = #tpu.dot_dimension_numbers<[1], [0], [0], [1], [0, 0, 1, 1], [], []>} : vector<8x32xf32>, vector<32x256xf32>, vector<8x256xf32> -> vector<8x256xf32>
    %43 = vector.extract_strided_slice %42 {offsets = [0, 0], sizes = [8, 32], strides = [1, 1]} : vector<8x256xf32> to vector<8x32xf32>
    %44 = vector.extract_strided_slice %42 {offsets = [0, 32], sizes = [8, 32], strides = [1, 1]} : vector<8x256xf32> to vector<8x32xf32>
    %45 = vector.extract_strided_slice %42 {offsets = [0, 64], sizes = [8, 32], strides = [1, 1]} : vector<8x256xf32> to vector<8x32xf32>
    %46 = vector.extract_strided_slice %42 {offsets = [0, 96], sizes = [8, 32], strides = [1, 1]} : vector<8x256xf32> to vector<8x32xf32>
    %47 = vector.extract_strided_slice %42 {offsets = [0, 128], sizes = [8, 32], strides = [1, 1]} : vector<8x256xf32> to vector<8x32xf32>
    %48 = vector.extract_strided_slice %42 {offsets = [0, 160], sizes = [8, 32], strides = [1, 1]} : vector<8x256xf32> to vector<8x32xf32>
    %49 = vector.extract_strided_slice %42 {offsets = [0, 192], sizes = [8, 32], strides = [1, 1]} : vector<8x256xf32> to vector<8x32xf32>
    %50 = vector.extract_strided_slice %42 {offsets = [0, 224], sizes = [8, 32], strides = [1, 1]} : vector<8x256xf32> to vector<8x32xf32>
    %51 = tpu.concatenate %43, %44, %45, %46, %47, %48, %49, %50 in 0 : vector<8x32xf32>, vector<8x32xf32>, vector<8x32xf32>, vector<8x32xf32>, vector<8x32xf32>, vector<8x32xf32>, vector<8x32xf32>, vector<8x32xf32> -> vector<64x32xf32>
    %cst_18 = arith.constant dense<0.000000e+00> : vector<64x8xf32>
    %52 = tpu.matmul %51, %41, %cst_18 {dimension_numbers = #tpu.dot_dimension_numbers<[1], [1], [0], [0], [0, 0, 1, 0], [], []>} : vector<64x32xf32>, vector<8x32xf32>, vector<64x8xf32> -> vector<64x8xf32>
    %53 = vector.extract_strided_slice %52 {offsets = [0, 0], sizes = [32, 8], strides = [1, 1]} : vector<64x8xf32> to vector<32x8xf32>
    %54 = vector.extract_strided_slice %52 {offsets = [32, 0], sizes = [32, 8], strides = [1, 1]} : vector<64x8xf32> to vector<32x8xf32>
    %cst_19 = arith.constant 0.000000e+00 : f32
    %55 = vector.broadcast %cst_19 : f32 to vector<32x8xf32>
    %56 = arith.select %12, %54, %55 : vector<32x8xi1>, vector<32x8xf32>
    %57 = arith.select %11, %53, %56 : vector<32x8xi1>, vector<32x8xf32>
    %cst_20 = arith.constant 0.000000e+00 : f32
    %58 = vector.broadcast %cst_20 : f32 to vector<32x8xf32>
    %59 = arith.mulf %29, %58 : vector<32x8xf32>
    %cst_21 = arith.constant 3.200000e+01 : f32
    %60 = vector.broadcast %cst_21 : f32 to vector<32x8xf32>
    %61 = arith.mulf %57, %60 : vector<32x8xf32>
    %62 = arith.addf %59, %61 : vector<32x8xf32>
    %63 = arith.subf %62, %17 : vector<32x8xf32>
    %cst_22 = arith.constant -1.000000e+09 : f32
    %64 = vector.broadcast %cst_22 : f32 to vector<32x8xf32>
    %65 = arith.select %23, %64, %63 : vector<32x8xi1>, vector<32x8xf32>
    %cst_23 = arith.constant dense<0xFF800000> : vector<32xf32>
    %66 = vector.multi_reduction <maximumf>, %65, %cst_23 [1] : vector<32x8xf32> to vector<32xf32>
    %67 = vector.shape_cast %66 : vector<32xf32> to vector<32x1xf32>
    %68 = vector.broadcast %67 : vector<32x1xf32> to vector<32x8xf32>
    %69 = arith.subf %65, %68 : vector<32x8xf32>
    %70 = math.exp %69 : vector<32x8xf32>
    %cst_24 = arith.constant dense<0.000000e+00> : vector<32xf32>
    %71 = vector.multi_reduction <add>, %70, %cst_24 [1] : vector<32x8xf32> to vector<32xf32>
    %72 = vector.shape_cast %71 : vector<32xf32> to vector<32x1xf32>
    %73 = tpu.reciprocal %72 {approx = true} : vector<32x1xf32> -> vector<32x1xf32>
    %74 = vector.broadcast %73 : vector<32x1xf32> to vector<32x8xf32>
    %75 = arith.mulf %70, %74 : vector<32x8xf32>
    %76 = vector.extract_strided_slice %75 {offsets = [0, 0], sizes = [8, 8], strides = [1, 1]} : vector<32x8xf32> to vector<8x8xf32>
    %77 = tpu.transpose %76, [1, 0] : vector<8x8xf32> -> vector<8x8xf32>
    %78 = vector.extract_strided_slice %75 {offsets = [8, 0], sizes = [8, 8], strides = [1, 1]} : vector<32x8xf32> to vector<8x8xf32>
    %79 = tpu.transpose %78, [1, 0] : vector<8x8xf32> -> vector<8x8xf32>
    %80 = vector.extract_strided_slice %75 {offsets = [16, 0], sizes = [8, 8], strides = [1, 1]} : vector<32x8xf32> to vector<8x8xf32>
    %81 = tpu.transpose %80, [1, 0] : vector<8x8xf32> -> vector<8x8xf32>
    %82 = vector.extract_strided_slice %75 {offsets = [24, 0], sizes = [8, 8], strides = [1, 1]} : vector<32x8xf32> to vector<8x8xf32>
    %83 = tpu.transpose %82, [1, 0] : vector<8x8xf32> -> vector<8x8xf32>
    %84 = tpu.concatenate %77, %79, %81, %83 in 0 : vector<8x8xf32>, vector<8x8xf32>, vector<8x8xf32>, vector<8x8xf32> -> vector<32x8xf32>
    %cst_25 = arith.constant 0.000000e+00 : f32
    %85 = vector.broadcast %cst_25 : f32 to vector<32x8xf32>
    %86 = arith.select %12, %84, %85 : vector<32x8xi1>, vector<32x8xf32>
    %cst_26 = arith.constant 0.000000e+00 : f32
    %87 = vector.broadcast %cst_26 : f32 to vector<32x8xf32>
    %88 = arith.select %11, %84, %87 : vector<32x8xi1>, vector<32x8xf32>
    %cst_27 = arith.constant 0.000000e+00 : f32
    %89 = vector.broadcast %cst_27 : f32 to vector<32x8xf32>
    %90 = arith.select %11, %75, %89 : vector<32x8xi1>, vector<32x8xf32>
    %cst_28 = arith.constant 0.000000e+00 : f32
    %91 = vector.broadcast %cst_28 : f32 to vector<32x8xf32>
    %92 = arith.select %12, %75, %91 : vector<32x8xi1>, vector<32x8xf32>
    %93 = tpu.concatenate %86, %88, %90, %92 in 0 : vector<32x8xf32>, vector<32x8xf32>, vector<32x8xf32>, vector<32x8xf32> -> vector<128x8xf32>
    %cst_29 = arith.constant dense<0.000000e+00> : vector<8x256xf32>
    %94 = tpu.matmul %41, %7, %cst_29 {dimension_numbers = #tpu.dot_dimension_numbers<[1], [0], [0], [1], [0, 0, 1, 1], [], []>} : vector<8x32xf32>, vector<32x256xf32>, vector<8x256xf32> -> vector<8x256xf32>
    %95 = vector.extract_strided_slice %94 {offsets = [0, 0], sizes = [8, 32], strides = [1, 1]} : vector<8x256xf32> to vector<8x32xf32>
    %96 = vector.extract_strided_slice %94 {offsets = [0, 32], sizes = [8, 32], strides = [1, 1]} : vector<8x256xf32> to vector<8x32xf32>
    %97 = vector.extract_strided_slice %94 {offsets = [0, 64], sizes = [8, 32], strides = [1, 1]} : vector<8x256xf32> to vector<8x32xf32>
    %98 = vector.extract_strided_slice %94 {offsets = [0, 96], sizes = [8, 32], strides = [1, 1]} : vector<8x256xf32> to vector<8x32xf32>
    %99 = vector.extract_strided_slice %94 {offsets = [0, 128], sizes = [8, 32], strides = [1, 1]} : vector<8x256xf32> to vector<8x32xf32>
    %100 = vector.extract_strided_slice %94 {offsets = [0, 160], sizes = [8, 32], strides = [1, 1]} : vector<8x256xf32> to vector<8x32xf32>
    %101 = vector.extract_strided_slice %94 {offsets = [0, 192], sizes = [8, 32], strides = [1, 1]} : vector<8x256xf32> to vector<8x32xf32>
    %102 = vector.extract_strided_slice %94 {offsets = [0, 224], sizes = [8, 32], strides = [1, 1]} : vector<8x256xf32> to vector<8x32xf32>
    %103 = tpu.concatenate %95, %96, %97, %98, %99, %100, %101, %102 in 0 : vector<8x32xf32>, vector<8x32xf32>, vector<8x32xf32>, vector<8x32xf32>, vector<8x32xf32>, vector<8x32xf32>, vector<8x32xf32>, vector<8x32xf32> -> vector<64x32xf32>
    %104 = tpu.concatenate %103, %51 in 0 : vector<64x32xf32>, vector<64x32xf32> -> vector<128x32xf32>
    %105 = tpu.transpose %93, [1, 0] : vector<128x8xf32> -> vector<8x128xf32>
    %cst_30 = arith.constant dense<0.000000e+00> : vector<8x32xf32>
    %106 = tpu.matmul %105, %104, %cst_30 {dimension_numbers = #tpu.dot_dimension_numbers<[1], [0], [0], [1], [0, 0, 1, 1], [], []>} : vector<8x128xf32>, vector<128x32xf32>, vector<8x32xf32> -> vector<8x32xf32>
    %cst_31 = arith.constant 0.000000e+00 : f32
    %107 = vector.broadcast %cst_31 : f32 to vector<8x32xf32>
    %108 = arith.mulf %25, %107 : vector<8x32xf32>
    %109 = arith.addf %1, %106 : vector<8x32xf32>
    %cst_32 = arith.constant 1.000000e+00 : f32
    %110 = vector.broadcast %cst_32 : f32 to vector<8x32xf32>
    %111 = arith.mulf %109, %110 : vector<8x32xf32>
    %112 = arith.addf %108, %111 : vector<8x32xf32>
    %cst_33 = arith.constant 0.000000e+00 : f32
    %113 = vector.broadcast %cst_33 : f32 to vector<8x32xf32>
    %114 = arith.mulf %113, %39 : vector<8x32xf32>
    %cst_34 = arith.constant dense<0xFF800000> : vector<8xf32>
    %115 = vector.multi_reduction <maximumf>, %112, %cst_34 [1] : vector<8x32xf32> to vector<8xf32>
    %116 = vector.shape_cast %115 : vector<8xf32> to vector<8x1xf32>
    %117 = vector.broadcast %116 : vector<8x1xf32> to vector<8x32xf32>
    %118 = arith.subf %112, %117 : vector<8x32xf32>
    %119 = math.exp %118 : vector<8x32xf32>
    %cst_35 = arith.constant dense<0.000000e+00> : vector<8xf32>
    %120 = vector.multi_reduction <add>, %119, %cst_35 [1] : vector<8x32xf32> to vector<8xf32>
    %121 = vector.shape_cast %120 : vector<8xf32> to vector<8x1xf32>
    %122 = tpu.reciprocal %121 {approx = true} : vector<8x1xf32> -> vector<8x1xf32>
    %123 = vector.broadcast %122 : vector<8x1xf32> to vector<8x32xf32>
    %124 = arith.mulf %119, %123 : vector<8x32xf32>
    %cst_36 = arith.constant 1.000000e+00 : f32
    %125 = vector.broadcast %cst_36 : f32 to vector<8x32xf32>
    %126 = arith.mulf %125, %124 : vector<8x32xf32>
    %127 = arith.addf %114, %126 : vector<8x32xf32>
    %128 = vector.broadcast %3 : vector<8x1xf32> to vector<8x32xf32>
    %129 = arith.mulf %127, %128 : vector<8x32xf32>
    %cst_37 = arith.constant dense<0.000000e+00> : vector<8x256xf32>
    %130 = tpu.matmul %129, %6, %cst_37 {dimension_numbers = #tpu.dot_dimension_numbers<[1], [0], [0], [1], [0, 0, 1, 1], [], []>} : vector<8x32xf32>, vector<32x256xf32>, vector<8x256xf32> -> vector<8x256xf32>
    %131 = vector.extract_strided_slice %130 {offsets = [0, 0], sizes = [8, 32], strides = [1, 1]} : vector<8x256xf32> to vector<8x32xf32>
    %132 = vector.extract_strided_slice %130 {offsets = [0, 32], sizes = [8, 32], strides = [1, 1]} : vector<8x256xf32> to vector<8x32xf32>
    %133 = vector.extract_strided_slice %130 {offsets = [0, 64], sizes = [8, 32], strides = [1, 1]} : vector<8x256xf32> to vector<8x32xf32>
    %134 = vector.extract_strided_slice %130 {offsets = [0, 96], sizes = [8, 32], strides = [1, 1]} : vector<8x256xf32> to vector<8x32xf32>
    %135 = vector.extract_strided_slice %130 {offsets = [0, 128], sizes = [8, 32], strides = [1, 1]} : vector<8x256xf32> to vector<8x32xf32>
    %136 = vector.extract_strided_slice %130 {offsets = [0, 160], sizes = [8, 32], strides = [1, 1]} : vector<8x256xf32> to vector<8x32xf32>
    %137 = vector.extract_strided_slice %130 {offsets = [0, 192], sizes = [8, 32], strides = [1, 1]} : vector<8x256xf32> to vector<8x32xf32>
    %138 = vector.extract_strided_slice %130 {offsets = [0, 224], sizes = [8, 32], strides = [1, 1]} : vector<8x256xf32> to vector<8x32xf32>
    %139 = tpu.concatenate %131, %132, %133, %134, %135, %136, %137, %138 in 0 : vector<8x32xf32>, vector<8x32xf32>, vector<8x32xf32>, vector<8x32xf32>, vector<8x32xf32>, vector<8x32xf32>, vector<8x32xf32>, vector<8x32xf32> -> vector<64x32xf32>
    %cst_38 = arith.constant dense<0.000000e+00> : vector<64x8xf32>
    %140 = tpu.matmul %139, %129, %cst_38 {dimension_numbers = #tpu.dot_dimension_numbers<[1], [1], [0], [0], [0, 0, 1, 0], [], []>} : vector<64x32xf32>, vector<8x32xf32>, vector<64x8xf32> -> vector<64x8xf32>
    %141 = vector.extract_strided_slice %140 {offsets = [0, 0], sizes = [32, 8], strides = [1, 1]} : vector<64x8xf32> to vector<32x8xf32>
    %142 = vector.extract_strided_slice %140 {offsets = [32, 0], sizes = [32, 8], strides = [1, 1]} : vector<64x8xf32> to vector<32x8xf32>
    %cst_39 = arith.constant 0.000000e+00 : f32
    %143 = vector.broadcast %cst_39 : f32 to vector<32x8xf32>
    %144 = arith.select %12, %142, %143 : vector<32x8xi1>, vector<32x8xf32>
    %145 = arith.select %11, %141, %144 : vector<32x8xi1>, vector<32x8xf32>
    %cst_40 = arith.constant 0.000000e+00 : f32
    %146 = vector.broadcast %cst_40 : f32 to vector<32x8xf32>
    %147 = arith.mulf %65, %146 : vector<32x8xf32>
    %cst_41 = arith.constant 3.200000e+01 : f32
    %148 = vector.broadcast %cst_41 : f32 to vector<32x8xf32>
    %149 = arith.mulf %145, %148 : vector<32x8xf32>
    %150 = arith.addf %147, %149 : vector<32x8xf32>
    %151 = arith.subf %150, %17 : vector<32x8xf32>
    %cst_42 = arith.constant -1.000000e+09 : f32
    %152 = vector.broadcast %cst_42 : f32 to vector<32x8xf32>
    %153 = arith.select %23, %152, %151 : vector<32x8xi1>, vector<32x8xf32>
    %cst_43 = arith.constant 0.000000e+00 : f32
    %154 = vector.broadcast %cst_43 : f32 to vector<32x8xf32>
    %155 = arith.mulf %154, %75 : vector<32x8xf32>
    %cst_44 = arith.constant dense<0xFF800000> : vector<32xf32>
    %156 = vector.multi_reduction <maximumf>, %153, %cst_44 [1] : vector<32x8xf32> to vector<32xf32>
    %157 = vector.shape_cast %156 : vector<32xf32> to vector<32x1xf32>
    %158 = vector.broadcast %157 : vector<32x1xf32> to vector<32x8xf32>
    %159 = arith.subf %153, %158 : vector<32x8xf32>
    %160 = math.exp %159 : vector<32x8xf32>
    %cst_45 = arith.constant dense<0.000000e+00> : vector<32xf32>
    %161 = vector.multi_reduction <add>, %160, %cst_45 [1] : vector<32x8xf32> to vector<32xf32>
    %162 = vector.shape_cast %161 : vector<32xf32> to vector<32x1xf32>
    %163 = tpu.reciprocal %162 {approx = true} : vector<32x1xf32> -> vector<32x1xf32>
    %164 = vector.broadcast %163 : vector<32x1xf32> to vector<32x8xf32>
    %165 = arith.mulf %160, %164 : vector<32x8xf32>
    %cst_46 = arith.constant 1.000000e+00 : f32
    %166 = vector.broadcast %cst_46 : f32 to vector<32x8xf32>
    %167 = arith.mulf %166, %165 : vector<32x8xf32>
    %168 = arith.addf %155, %167 : vector<32x8xf32>
    %169 = vector.extract_strided_slice %168 {offsets = [0, 0], sizes = [8, 8], strides = [1, 1]} : vector<32x8xf32> to vector<8x8xf32>
    %170 = tpu.transpose %169, [1, 0] : vector<8x8xf32> -> vector<8x8xf32>
    %171 = vector.extract_strided_slice %168 {offsets = [8, 0], sizes = [8, 8], strides = [1, 1]} : vector<32x8xf32> to vector<8x8xf32>
    %172 = tpu.transpose %171, [1, 0] : vector<8x8xf32> -> vector<8x8xf32>
    %173 = vector.extract_strided_slice %168 {offsets = [16, 0], sizes = [8, 8], strides = [1, 1]} : vector<32x8xf32> to vector<8x8xf32>
    %174 = tpu.transpose %173, [1, 0] : vector<8x8xf32> -> vector<8x8xf32>
    %175 = vector.extract_strided_slice %168 {offsets = [24, 0], sizes = [8, 8], strides = [1, 1]} : vector<32x8xf32> to vector<8x8xf32>
    %176 = tpu.transpose %175, [1, 0] : vector<8x8xf32> -> vector<8x8xf32>
    %177 = tpu.concatenate %170, %172, %174, %176 in 0 : vector<8x8xf32>, vector<8x8xf32>, vector<8x8xf32>, vector<8x8xf32> -> vector<32x8xf32>
    %cst_47 = arith.constant 0.000000e+00 : f32
    %178 = vector.broadcast %cst_47 : f32 to vector<32x8xf32>
    %179 = arith.select %12, %177, %178 : vector<32x8xi1>, vector<32x8xf32>
    %cst_48 = arith.constant 0.000000e+00 : f32
    %180 = vector.broadcast %cst_48 : f32 to vector<32x8xf32>
    %181 = arith.select %11, %177, %180 : vector<32x8xi1>, vector<32x8xf32>
    %cst_49 = arith.constant 0.000000e+00 : f32
    %182 = vector.broadcast %cst_49 : f32 to vector<32x8xf32>
    %183 = arith.select %11, %168, %182 : vector<32x8xi1>, vector<32x8xf32>
    %cst_50 = arith.constant 0.000000e+00 : f32
    %184 = vector.broadcast %cst_50 : f32 to vector<32x8xf32>
    %185 = arith.select %12, %168, %184 : vector<32x8xi1>, vector<32x8xf32>
    %186 = tpu.concatenate %179, %181, %183, %185 in 0 : vector<32x8xf32>, vector<32x8xf32>, vector<32x8xf32>, vector<32x8xf32> -> vector<128x8xf32>
    %cst_51 = arith.constant dense<0.000000e+00> : vector<8x256xf32>
    %187 = tpu.matmul %129, %7, %cst_51 {dimension_numbers = #tpu.dot_dimension_numbers<[1], [0], [0], [1], [0, 0, 1, 1], [], []>} : vector<8x32xf32>, vector<32x256xf32>, vector<8x256xf32> -> vector<8x256xf32>
    %188 = vector.extract_strided_slice %187 {offsets = [0, 0], sizes = [8, 32], strides = [1, 1]} : vector<8x256xf32> to vector<8x32xf32>
    %189 = vector.extract_strided_slice %187 {offsets = [0, 32], sizes = [8, 32], strides = [1, 1]} : vector<8x256xf32> to vector<8x32xf32>
    %190 = vector.extract_strided_slice %187 {offsets = [0, 64], sizes = [8, 32], strides = [1, 1]} : vector<8x256xf32> to vector<8x32xf32>
    %191 = vector.extract_strided_slice %187 {offsets = [0, 96], sizes = [8, 32], strides = [1, 1]} : vector<8x256xf32> to vector<8x32xf32>
    %192 = vector.extract_strided_slice %187 {offsets = [0, 128], sizes = [8, 32], strides = [1, 1]} : vector<8x256xf32> to vector<8x32xf32>
    %193 = vector.extract_strided_slice %187 {offsets = [0, 160], sizes = [8, 32], strides = [1, 1]} : vector<8x256xf32> to vector<8x32xf32>
    %194 = vector.extract_strided_slice %187 {offsets = [0, 192], sizes = [8, 32], strides = [1, 1]} : vector<8x256xf32> to vector<8x32xf32>
    %195 = vector.extract_strided_slice %187 {offsets = [0, 224], sizes = [8, 32], strides = [1, 1]} : vector<8x256xf32> to vector<8x32xf32>
    %196 = tpu.concatenate %188, %189, %190, %191, %192, %193, %194, %195 in 0 : vector<8x32xf32>, vector<8x32xf32>, vector<8x32xf32>, vector<8x32xf32>, vector<8x32xf32>, vector<8x32xf32>, vector<8x32xf32>, vector<8x32xf32> -> vector<64x32xf32>
    %197 = tpu.concatenate %196, %139 in 0 : vector<64x32xf32>, vector<64x32xf32> -> vector<128x32xf32>
    %198 = tpu.transpose %186, [1, 0] : vector<128x8xf32> -> vector<8x128xf32>
    %cst_52 = arith.constant dense<0.000000e+00> : vector<8x32xf32>
    %199 = tpu.matmul %198, %197, %cst_52 {dimension_numbers = #tpu.dot_dimension_numbers<[1], [0], [0], [1], [0, 0, 1, 1], [], []>} : vector<8x128xf32>, vector<128x32xf32>, vector<8x32xf32> -> vector<8x32xf32>
    %cst_53 = arith.constant 0.000000e+00 : f32
    %200 = vector.broadcast %cst_53 : f32 to vector<8x32xf32>
    %201 = arith.mulf %112, %200 : vector<8x32xf32>
    %202 = arith.addf %1, %199 : vector<8x32xf32>
    %cst_54 = arith.constant 1.000000e+00 : f32
    %203 = vector.broadcast %cst_54 : f32 to vector<8x32xf32>
    %204 = arith.mulf %202, %203 : vector<8x32xf32>
    %205 = arith.addf %201, %204 : vector<8x32xf32>
    %cst_55 = arith.constant 0.000000e+00 : f32
    %206 = vector.broadcast %cst_55 : f32 to vector<8x32xf32>
    %207 = arith.mulf %206, %127 : vector<8x32xf32>
    %cst_56 = arith.constant dense<0xFF800000> : vector<8xf32>
    %208 = vector.multi_reduction <maximumf>, %205, %cst_56 [1] : vector<8x32xf32> to vector<8xf32>
    %209 = vector.shape_cast %208 : vector<8xf32> to vector<8x1xf32>
    %210 = vector.broadcast %209 : vector<8x1xf32> to vector<8x32xf32>
    %211 = arith.subf %205, %210 : vector<8x32xf32>
    %212 = math.exp %211 : vector<8x32xf32>
    %cst_57 = arith.constant dense<0.000000e+00> : vector<8xf32>
    %213 = vector.multi_reduction <add>, %212, %cst_57 [1] : vector<8x32xf32> to vector<8xf32>
    %214 = vector.shape_cast %213 : vector<8xf32> to vector<8x1xf32>
    %215 = tpu.reciprocal %214 {approx = true} : vector<8x1xf32> -> vector<8x1xf32>
    %216 = vector.broadcast %215 : vector<8x1xf32> to vector<8x32xf32>
    %217 = arith.mulf %212, %216 : vector<8x32xf32>
    %cst_58 = arith.constant 1.000000e+00 : f32
    %218 = vector.broadcast %cst_58 : f32 to vector<8x32xf32>
    %219 = arith.mulf %218, %217 : vector<8x32xf32>
    %220 = arith.addf %207, %219 : vector<8x32xf32>
    %221 = vector.broadcast %3 : vector<8x1xf32> to vector<8x32xf32>
    %222 = arith.mulf %220, %221 : vector<8x32xf32>
    %cst_59 = arith.constant dense<0.000000e+00> : vector<8x256xf32>
    %223 = tpu.matmul %222, %6, %cst_59 {dimension_numbers = #tpu.dot_dimension_numbers<[1], [0], [0], [1], [0, 0, 1, 1], [], []>} : vector<8x32xf32>, vector<32x256xf32>, vector<8x256xf32> -> vector<8x256xf32>
    %224 = vector.extract_strided_slice %223 {offsets = [0, 0], sizes = [8, 32], strides = [1, 1]} : vector<8x256xf32> to vector<8x32xf32>
    %225 = vector.extract_strided_slice %223 {offsets = [0, 32], sizes = [8, 32], strides = [1, 1]} : vector<8x256xf32> to vector<8x32xf32>
    %226 = vector.extract_strided_slice %223 {offsets = [0, 64], sizes = [8, 32], strides = [1, 1]} : vector<8x256xf32> to vector<8x32xf32>
    %227 = vector.extract_strided_slice %223 {offsets = [0, 96], sizes = [8, 32], strides = [1, 1]} : vector<8x256xf32> to vector<8x32xf32>
    %228 = vector.extract_strided_slice %223 {offsets = [0, 128], sizes = [8, 32], strides = [1, 1]} : vector<8x256xf32> to vector<8x32xf32>
    %229 = vector.extract_strided_slice %223 {offsets = [0, 160], sizes = [8, 32], strides = [1, 1]} : vector<8x256xf32> to vector<8x32xf32>
    %230 = vector.extract_strided_slice %223 {offsets = [0, 192], sizes = [8, 32], strides = [1, 1]} : vector<8x256xf32> to vector<8x32xf32>
    %231 = vector.extract_strided_slice %223 {offsets = [0, 224], sizes = [8, 32], strides = [1, 1]} : vector<8x256xf32> to vector<8x32xf32>
    %232 = tpu.concatenate %224, %225, %226, %227, %228, %229, %230, %231 in 0 : vector<8x32xf32>, vector<8x32xf32>, vector<8x32xf32>, vector<8x32xf32>, vector<8x32xf32>, vector<8x32xf32>, vector<8x32xf32>, vector<8x32xf32> -> vector<64x32xf32>
    %cst_60 = arith.constant dense<0.000000e+00> : vector<64x8xf32>
    %233 = tpu.matmul %232, %222, %cst_60 {dimension_numbers = #tpu.dot_dimension_numbers<[1], [1], [0], [0], [0, 0, 1, 0], [], []>} : vector<64x32xf32>, vector<8x32xf32>, vector<64x8xf32> -> vector<64x8xf32>
    %234 = vector.extract_strided_slice %233 {offsets = [0, 0], sizes = [32, 8], strides = [1, 1]} : vector<64x8xf32> to vector<32x8xf32>
    %235 = vector.extract_strided_slice %233 {offsets = [32, 0], sizes = [32, 8], strides = [1, 1]} : vector<64x8xf32> to vector<32x8xf32>
    %cst_61 = arith.constant 0.000000e+00 : f32
    %236 = vector.broadcast %cst_61 : f32 to vector<32x8xf32>
    %237 = arith.select %12, %235, %236 : vector<32x8xi1>, vector<32x8xf32>
    %238 = arith.select %11, %234, %237 : vector<32x8xi1>, vector<32x8xf32>
    %cst_62 = arith.constant 0.000000e+00 : f32
    %239 = vector.broadcast %cst_62 : f32 to vector<32x8xf32>
    %240 = arith.mulf %153, %239 : vector<32x8xf32>
    %cst_63 = arith.constant 3.200000e+01 : f32
    %241 = vector.broadcast %cst_63 : f32 to vector<32x8xf32>
    %242 = arith.mulf %238, %241 : vector<32x8xf32>
    %243 = arith.addf %240, %242 : vector<32x8xf32>
    %244 = arith.subf %243, %17 : vector<32x8xf32>
    %cst_64 = arith.constant -1.000000e+09 : f32
    %245 = vector.broadcast %cst_64 : f32 to vector<32x8xf32>
    %246 = arith.select %23, %245, %244 : vector<32x8xi1>, vector<32x8xf32>
    %cst_65 = arith.constant 0.000000e+00 : f32
    %247 = vector.broadcast %cst_65 : f32 to vector<32x8xf32>
    %248 = arith.mulf %247, %168 : vector<32x8xf32>
    %cst_66 = arith.constant dense<0xFF800000> : vector<32xf32>
    %249 = vector.multi_reduction <maximumf>, %246, %cst_66 [1] : vector<32x8xf32> to vector<32xf32>
    %250 = vector.shape_cast %249 : vector<32xf32> to vector<32x1xf32>
    %251 = vector.broadcast %250 : vector<32x1xf32> to vector<32x8xf32>
    %252 = arith.subf %246, %251 : vector<32x8xf32>
    %253 = math.exp %252 : vector<32x8xf32>
    %cst_67 = arith.constant dense<0.000000e+00> : vector<32xf32>
    %254 = vector.multi_reduction <add>, %253, %cst_67 [1] : vector<32x8xf32> to vector<32xf32>
    %255 = vector.shape_cast %254 : vector<32xf32> to vector<32x1xf32>
    %256 = tpu.reciprocal %255 {approx = true} : vector<32x1xf32> -> vector<32x1xf32>
    %257 = vector.broadcast %256 : vector<32x1xf32> to vector<32x8xf32>
    %258 = arith.mulf %253, %257 : vector<32x8xf32>
    %cst_68 = arith.constant 1.000000e+00 : f32
    %259 = vector.broadcast %cst_68 : f32 to vector<32x8xf32>
    %260 = arith.mulf %259, %258 : vector<32x8xf32>
    %261 = arith.addf %248, %260 : vector<32x8xf32>
    %262 = vector.extract_strided_slice %261 {offsets = [0, 0], sizes = [8, 8], strides = [1, 1]} : vector<32x8xf32> to vector<8x8xf32>
    %263 = tpu.transpose %262, [1, 0] : vector<8x8xf32> -> vector<8x8xf32>
    %264 = vector.extract_strided_slice %261 {offsets = [8, 0], sizes = [8, 8], strides = [1, 1]} : vector<32x8xf32> to vector<8x8xf32>
    %265 = tpu.transpose %264, [1, 0] : vector<8x8xf32> -> vector<8x8xf32>
    %266 = vector.extract_strided_slice %261 {offsets = [16, 0], sizes = [8, 8], strides = [1, 1]} : vector<32x8xf32> to vector<8x8xf32>
    %267 = tpu.transpose %266, [1, 0] : vector<8x8xf32> -> vector<8x8xf32>
    %268 = vector.extract_strided_slice %261 {offsets = [24, 0], sizes = [8, 8], strides = [1, 1]} : vector<32x8xf32> to vector<8x8xf32>
    %269 = tpu.transpose %268, [1, 0] : vector<8x8xf32> -> vector<8x8xf32>
    %270 = tpu.concatenate %263, %265, %267, %269 in 0 : vector<8x8xf32>, vector<8x8xf32>, vector<8x8xf32>, vector<8x8xf32> -> vector<32x8xf32>
    %cst_69 = arith.constant 0.000000e+00 : f32
    %271 = vector.broadcast %cst_69 : f32 to vector<32x8xf32>
    %272 = arith.select %12, %270, %271 : vector<32x8xi1>, vector<32x8xf32>
    %cst_70 = arith.constant 0.000000e+00 : f32
    %273 = vector.broadcast %cst_70 : f32 to vector<32x8xf32>
    %274 = arith.select %11, %270, %273 : vector<32x8xi1>, vector<32x8xf32>
    %cst_71 = arith.constant 0.000000e+00 : f32
    %275 = vector.broadcast %cst_71 : f32 to vector<32x8xf32>
    %276 = arith.select %11, %261, %275 : vector<32x8xi1>, vector<32x8xf32>
    %cst_72 = arith.constant 0.000000e+00 : f32
    %277 = vector.broadcast %cst_72 : f32 to vector<32x8xf32>
    %278 = arith.select %12, %261, %277 : vector<32x8xi1>, vector<32x8xf32>
    %279 = tpu.concatenate %272, %274, %276, %278 in 0 : vector<32x8xf32>, vector<32x8xf32>, vector<32x8xf32>, vector<32x8xf32> -> vector<128x8xf32>
    %cst_73 = arith.constant dense<0.000000e+00> : vector<8x256xf32>
    %280 = tpu.matmul %222, %7, %cst_73 {dimension_numbers = #tpu.dot_dimension_numbers<[1], [0], [0], [1], [0, 0, 1, 1], [], []>} : vector<8x32xf32>, vector<32x256xf32>, vector<8x256xf32> -> vector<8x256xf32>
    %281 = vector.extract_strided_slice %280 {offsets = [0, 0], sizes = [8, 32], strides = [1, 1]} : vector<8x256xf32> to vector<8x32xf32>
    %282 = vector.extract_strided_slice %280 {offsets = [0, 32], sizes = [8, 32], strides = [1, 1]} : vector<8x256xf32> to vector<8x32xf32>
    %283 = vector.extract_strided_slice %280 {offsets = [0, 64], sizes = [8, 32], strides = [1, 1]} : vector<8x256xf32> to vector<8x32xf32>
    %284 = vector.extract_strided_slice %280 {offsets = [0, 96], sizes = [8, 32], strides = [1, 1]} : vector<8x256xf32> to vector<8x32xf32>
    %285 = vector.extract_strided_slice %280 {offsets = [0, 128], sizes = [8, 32], strides = [1, 1]} : vector<8x256xf32> to vector<8x32xf32>
    %286 = vector.extract_strided_slice %280 {offsets = [0, 160], sizes = [8, 32], strides = [1, 1]} : vector<8x256xf32> to vector<8x32xf32>
    %287 = vector.extract_strided_slice %280 {offsets = [0, 192], sizes = [8, 32], strides = [1, 1]} : vector<8x256xf32> to vector<8x32xf32>
    %288 = vector.extract_strided_slice %280 {offsets = [0, 224], sizes = [8, 32], strides = [1, 1]} : vector<8x256xf32> to vector<8x32xf32>
    %289 = tpu.concatenate %281, %282, %283, %284, %285, %286, %287, %288 in 0 : vector<8x32xf32>, vector<8x32xf32>, vector<8x32xf32>, vector<8x32xf32>, vector<8x32xf32>, vector<8x32xf32>, vector<8x32xf32>, vector<8x32xf32> -> vector<64x32xf32>
    %290 = tpu.concatenate %289, %232 in 0 : vector<64x32xf32>, vector<64x32xf32> -> vector<128x32xf32>
    %291 = tpu.transpose %279, [1, 0] : vector<128x8xf32> -> vector<8x128xf32>
    %cst_74 = arith.constant dense<0.000000e+00> : vector<8x32xf32>
    %292 = tpu.matmul %291, %290, %cst_74 {dimension_numbers = #tpu.dot_dimension_numbers<[1], [0], [0], [1], [0, 0, 1, 1], [], []>} : vector<8x128xf32>, vector<128x32xf32>, vector<8x32xf32> -> vector<8x32xf32>
    %cst_75 = arith.constant 0.000000e+00 : f32
    %293 = vector.broadcast %cst_75 : f32 to vector<8x32xf32>
    %294 = arith.mulf %205, %293 : vector<8x32xf32>
    %295 = arith.addf %1, %292 : vector<8x32xf32>
    %cst_76 = arith.constant 1.000000e+00 : f32
    %296 = vector.broadcast %cst_76 : f32 to vector<8x32xf32>
    %297 = arith.mulf %295, %296 : vector<8x32xf32>
    %298 = arith.addf %294, %297 : vector<8x32xf32>
    %cst_77 = arith.constant 0.000000e+00 : f32
    %299 = vector.broadcast %cst_77 : f32 to vector<8x32xf32>
    %300 = arith.mulf %299, %220 : vector<8x32xf32>
    %cst_78 = arith.constant dense<0xFF800000> : vector<8xf32>
    %301 = vector.multi_reduction <maximumf>, %298, %cst_78 [1] : vector<8x32xf32> to vector<8xf32>
    %302 = vector.shape_cast %301 : vector<8xf32> to vector<8x1xf32>
    %303 = vector.broadcast %302 : vector<8x1xf32> to vector<8x32xf32>
    %304 = arith.subf %298, %303 : vector<8x32xf32>
    %305 = math.exp %304 : vector<8x32xf32>
    %cst_79 = arith.constant dense<0.000000e+00> : vector<8xf32>
    %306 = vector.multi_reduction <add>, %305, %cst_79 [1] : vector<8x32xf32> to vector<8xf32>
    %307 = vector.shape_cast %306 : vector<8xf32> to vector<8x1xf32>
    %308 = tpu.reciprocal %307 {approx = true} : vector<8x1xf32> -> vector<8x1xf32>
    %309 = vector.broadcast %308 : vector<8x1xf32> to vector<8x32xf32>
    %310 = arith.mulf %305, %309 : vector<8x32xf32>
    %cst_80 = arith.constant 1.000000e+00 : f32
    %311 = vector.broadcast %cst_80 : f32 to vector<8x32xf32>
    %312 = arith.mulf %311, %310 : vector<8x32xf32>
    %313 = arith.addf %300, %312 : vector<8x32xf32>
    %314 = vector.broadcast %3 : vector<8x1xf32> to vector<8x32xf32>
    %315 = arith.mulf %313, %314 : vector<8x32xf32>
    %cst_81 = arith.constant dense<0.000000e+00> : vector<8x256xf32>
    %316 = tpu.matmul %315, %6, %cst_81 {dimension_numbers = #tpu.dot_dimension_numbers<[1], [0], [0], [1], [0, 0, 1, 1], [], []>} : vector<8x32xf32>, vector<32x256xf32>, vector<8x256xf32> -> vector<8x256xf32>
    %317 = vector.extract_strided_slice %316 {offsets = [0, 0], sizes = [8, 32], strides = [1, 1]} : vector<8x256xf32> to vector<8x32xf32>
    %318 = vector.extract_strided_slice %316 {offsets = [0, 32], sizes = [8, 32], strides = [1, 1]} : vector<8x256xf32> to vector<8x32xf32>
    %319 = vector.extract_strided_slice %316 {offsets = [0, 64], sizes = [8, 32], strides = [1, 1]} : vector<8x256xf32> to vector<8x32xf32>
    %320 = vector.extract_strided_slice %316 {offsets = [0, 96], sizes = [8, 32], strides = [1, 1]} : vector<8x256xf32> to vector<8x32xf32>
    %321 = vector.extract_strided_slice %316 {offsets = [0, 128], sizes = [8, 32], strides = [1, 1]} : vector<8x256xf32> to vector<8x32xf32>
    %322 = vector.extract_strided_slice %316 {offsets = [0, 160], sizes = [8, 32], strides = [1, 1]} : vector<8x256xf32> to vector<8x32xf32>
    %323 = vector.extract_strided_slice %316 {offsets = [0, 192], sizes = [8, 32], strides = [1, 1]} : vector<8x256xf32> to vector<8x32xf32>
    %324 = vector.extract_strided_slice %316 {offsets = [0, 224], sizes = [8, 32], strides = [1, 1]} : vector<8x256xf32> to vector<8x32xf32>
    %325 = tpu.concatenate %317, %318, %319, %320, %321, %322, %323, %324 in 0 : vector<8x32xf32>, vector<8x32xf32>, vector<8x32xf32>, vector<8x32xf32>, vector<8x32xf32>, vector<8x32xf32>, vector<8x32xf32>, vector<8x32xf32> -> vector<64x32xf32>
    %cst_82 = arith.constant dense<0.000000e+00> : vector<64x8xf32>
    %326 = tpu.matmul %325, %315, %cst_82 {dimension_numbers = #tpu.dot_dimension_numbers<[1], [1], [0], [0], [0, 0, 1, 0], [], []>} : vector<64x32xf32>, vector<8x32xf32>, vector<64x8xf32> -> vector<64x8xf32>
    %327 = vector.extract_strided_slice %326 {offsets = [0, 0], sizes = [32, 8], strides = [1, 1]} : vector<64x8xf32> to vector<32x8xf32>
    %328 = vector.extract_strided_slice %326 {offsets = [32, 0], sizes = [32, 8], strides = [1, 1]} : vector<64x8xf32> to vector<32x8xf32>
    %cst_83 = arith.constant 0.000000e+00 : f32
    %329 = vector.broadcast %cst_83 : f32 to vector<32x8xf32>
    %330 = arith.select %12, %328, %329 : vector<32x8xi1>, vector<32x8xf32>
    %331 = arith.select %11, %327, %330 : vector<32x8xi1>, vector<32x8xf32>
    %cst_84 = arith.constant 0.000000e+00 : f32
    %332 = vector.broadcast %cst_84 : f32 to vector<32x8xf32>
    %333 = arith.mulf %246, %332 : vector<32x8xf32>
    %cst_85 = arith.constant 3.200000e+01 : f32
    %334 = vector.broadcast %cst_85 : f32 to vector<32x8xf32>
    %335 = arith.mulf %331, %334 : vector<32x8xf32>
    %336 = arith.addf %333, %335 : vector<32x8xf32>
    %337 = arith.subf %336, %17 : vector<32x8xf32>
    %cst_86 = arith.constant -1.000000e+09 : f32
    %338 = vector.broadcast %cst_86 : f32 to vector<32x8xf32>
    %339 = arith.select %23, %338, %337 : vector<32x8xi1>, vector<32x8xf32>
    %cst_87 = arith.constant 0.000000e+00 : f32
    %340 = vector.broadcast %cst_87 : f32 to vector<32x8xf32>
    %341 = arith.mulf %340, %261 : vector<32x8xf32>
    %cst_88 = arith.constant dense<0xFF800000> : vector<32xf32>
    %342 = vector.multi_reduction <maximumf>, %339, %cst_88 [1] : vector<32x8xf32> to vector<32xf32>
    %343 = vector.shape_cast %342 : vector<32xf32> to vector<32x1xf32>
    %344 = vector.broadcast %343 : vector<32x1xf32> to vector<32x8xf32>
    %345 = arith.subf %339, %344 : vector<32x8xf32>
    %346 = math.exp %345 : vector<32x8xf32>
    %cst_89 = arith.constant dense<0.000000e+00> : vector<32xf32>
    %347 = vector.multi_reduction <add>, %346, %cst_89 [1] : vector<32x8xf32> to vector<32xf32>
    %348 = vector.shape_cast %347 : vector<32xf32> to vector<32x1xf32>
    %349 = tpu.reciprocal %348 {approx = true} : vector<32x1xf32> -> vector<32x1xf32>
    %350 = vector.broadcast %349 : vector<32x1xf32> to vector<32x8xf32>
    %351 = arith.mulf %346, %350 : vector<32x8xf32>
    %cst_90 = arith.constant 1.000000e+00 : f32
    %352 = vector.broadcast %cst_90 : f32 to vector<32x8xf32>
    %353 = arith.mulf %352, %351 : vector<32x8xf32>
    %354 = arith.addf %341, %353 : vector<32x8xf32>
    %355 = vector.extract_strided_slice %354 {offsets = [0, 0], sizes = [8, 8], strides = [1, 1]} : vector<32x8xf32> to vector<8x8xf32>
    %356 = tpu.transpose %355, [1, 0] : vector<8x8xf32> -> vector<8x8xf32>
    %357 = vector.extract_strided_slice %354 {offsets = [8, 0], sizes = [8, 8], strides = [1, 1]} : vector<32x8xf32> to vector<8x8xf32>
    %358 = tpu.transpose %357, [1, 0] : vector<8x8xf32> -> vector<8x8xf32>
    %359 = vector.extract_strided_slice %354 {offsets = [16, 0], sizes = [8, 8], strides = [1, 1]} : vector<32x8xf32> to vector<8x8xf32>
    %360 = tpu.transpose %359, [1, 0] : vector<8x8xf32> -> vector<8x8xf32>
    %361 = vector.extract_strided_slice %354 {offsets = [24, 0], sizes = [8, 8], strides = [1, 1]} : vector<32x8xf32> to vector<8x8xf32>
    %362 = tpu.transpose %361, [1, 0] : vector<8x8xf32> -> vector<8x8xf32>
    %363 = tpu.concatenate %356, %358, %360, %362 in 0 : vector<8x8xf32>, vector<8x8xf32>, vector<8x8xf32>, vector<8x8xf32> -> vector<32x8xf32>
    %cst_91 = arith.constant 0.000000e+00 : f32
    %364 = vector.broadcast %cst_91 : f32 to vector<32x8xf32>
    %365 = arith.select %12, %363, %364 : vector<32x8xi1>, vector<32x8xf32>
    %cst_92 = arith.constant 0.000000e+00 : f32
    %366 = vector.broadcast %cst_92 : f32 to vector<32x8xf32>
    %367 = arith.select %11, %363, %366 : vector<32x8xi1>, vector<32x8xf32>
    %cst_93 = arith.constant 0.000000e+00 : f32
    %368 = vector.broadcast %cst_93 : f32 to vector<32x8xf32>
    %369 = arith.select %11, %354, %368 : vector<32x8xi1>, vector<32x8xf32>
    %cst_94 = arith.constant 0.000000e+00 : f32
    %370 = vector.broadcast %cst_94 : f32 to vector<32x8xf32>
    %371 = arith.select %12, %354, %370 : vector<32x8xi1>, vector<32x8xf32>
    %372 = tpu.concatenate %365, %367, %369, %371 in 0 : vector<32x8xf32>, vector<32x8xf32>, vector<32x8xf32>, vector<32x8xf32> -> vector<128x8xf32>
    %cst_95 = arith.constant dense<0.000000e+00> : vector<8x256xf32>
    %373 = tpu.matmul %315, %7, %cst_95 {dimension_numbers = #tpu.dot_dimension_numbers<[1], [0], [0], [1], [0, 0, 1, 1], [], []>} : vector<8x32xf32>, vector<32x256xf32>, vector<8x256xf32> -> vector<8x256xf32>
    %374 = vector.extract_strided_slice %373 {offsets = [0, 0], sizes = [8, 32], strides = [1, 1]} : vector<8x256xf32> to vector<8x32xf32>
    %375 = vector.extract_strided_slice %373 {offsets = [0, 32], sizes = [8, 32], strides = [1, 1]} : vector<8x256xf32> to vector<8x32xf32>
    %376 = vector.extract_strided_slice %373 {offsets = [0, 64], sizes = [8, 32], strides = [1, 1]} : vector<8x256xf32> to vector<8x32xf32>
    %377 = vector.extract_strided_slice %373 {offsets = [0, 96], sizes = [8, 32], strides = [1, 1]} : vector<8x256xf32> to vector<8x32xf32>
    %378 = vector.extract_strided_slice %373 {offsets = [0, 128], sizes = [8, 32], strides = [1, 1]} : vector<8x256xf32> to vector<8x32xf32>
    %379 = vector.extract_strided_slice %373 {offsets = [0, 160], sizes = [8, 32], strides = [1, 1]} : vector<8x256xf32> to vector<8x32xf32>
    %380 = vector.extract_strided_slice %373 {offsets = [0, 192], sizes = [8, 32], strides = [1, 1]} : vector<8x256xf32> to vector<8x32xf32>
    %381 = vector.extract_strided_slice %373 {offsets = [0, 224], sizes = [8, 32], strides = [1, 1]} : vector<8x256xf32> to vector<8x32xf32>
    %382 = tpu.concatenate %374, %375, %376, %377, %378, %379, %380, %381 in 0 : vector<8x32xf32>, vector<8x32xf32>, vector<8x32xf32>, vector<8x32xf32>, vector<8x32xf32>, vector<8x32xf32>, vector<8x32xf32>, vector<8x32xf32> -> vector<64x32xf32>
    %383 = tpu.concatenate %382, %325 in 0 : vector<64x32xf32>, vector<64x32xf32> -> vector<128x32xf32>
    %384 = tpu.transpose %372, [1, 0] : vector<128x8xf32> -> vector<8x128xf32>
    %cst_96 = arith.constant dense<0.000000e+00> : vector<8x32xf32>
    %385 = tpu.matmul %384, %383, %cst_96 {dimension_numbers = #tpu.dot_dimension_numbers<[1], [0], [0], [1], [0, 0, 1, 1], [], []>} : vector<8x128xf32>, vector<128x32xf32>, vector<8x32xf32> -> vector<8x32xf32>
    %cst_97 = arith.constant 0.000000e+00 : f32
    %386 = vector.broadcast %cst_97 : f32 to vector<8x32xf32>
    %387 = arith.mulf %298, %386 : vector<8x32xf32>
    %388 = arith.addf %1, %385 : vector<8x32xf32>
    %cst_98 = arith.constant 1.000000e+00 : f32
    %389 = vector.broadcast %cst_98 : f32 to vector<8x32xf32>
    %390 = arith.mulf %388, %389 : vector<8x32xf32>
    %391 = arith.addf %387, %390 : vector<8x32xf32>
    %c0_99 = arith.constant 0 : index
    %c0_100 = arith.constant 0 : index
    %c0_101 = arith.constant 0 : index
    %392 = vector.load %arg6[%c0_99, %c0_100, %c0_101] : memref<1x8x32xf32, #tpu.memory_space<vmem>>, vector<1x8x32xf32>
    %393 = vector.shape_cast %392 : vector<1x8x32xf32> to vector<8x32xf32>
    %394 = vector.shape_cast %391 : vector<8x32xf32> to vector<1x8x32xf32>
    tpu.vector_store %arg6[%c0_99, %c0_100, %c0_101], %394 {strides = array<i32>} : memref<1x8x32xf32, #tpu.memory_space<vmem>>, vector<1x8x32xf32>,
    return
  }
  func.func @transform_0(%arg0: i32) -> (i32, i32, i32) {
    %c0_i32 = arith.constant 0 : i32
    %c0_i32_0 = arith.constant 0 : i32
    %c0_i32_1 = arith.constant 0 : i32
    return %arg0, %c0_i32, %c0_i32_0 : i32, i32, i32
  }
  func.func @transform_1(%arg0: i32) -> (i32, i32, i32) {
    %c0_i32 = arith.constant 0 : i32
    %c0_i32_0 = arith.constant 0 : i32
    %c0_i32_1 = arith.constant 0 : i32
    return %arg0, %c0_i32, %c0_i32_0 : i32, i32, i32
  }
  func.func @transform_2(%arg0: i32) -> (i32, i32, i32) {
    %c0_i32 = arith.constant 0 : i32
    %c0_i32_0 = arith.constant 0 : i32
    %c0_i32_1 = arith.constant 0 : i32
    return %arg0, %c0_i32, %c0_i32_0 : i32, i32, i32
  }
  func.func @transform_3(%arg0: i32) -> (i32, i32) {
    %c0_i32 = arith.constant 0 : i32
    %c0_i32_0 = arith.constant 0 : i32
    %c0_i32_1 = arith.constant 0 : i32
    return %c0_i32, %c0_i32_0 : i32, i32
  }
  func.func @transform_4(%arg0: i32) -> (i32, i32) {
    %c0_i32 = arith.constant 0 : i32
    %c0_i32_0 = arith.constant 0 : i32
    %c0_i32_1 = arith.constant 0 : i32
    return %c0_i32, %c0_i32_0 : i32, i32
  }
  func.func @transform_5(%arg0: i32) -> (i32, i32, i32) {
    %c0_i32 = arith.constant 0 : i32
    %c0_i32_0 = arith.constant 0 : i32
    %c0_i32_1 = arith.constant 0 : i32
    return %arg0, %c0_i32, %c0_i32_0 : i32, i32, i32
  }
}

</mosaic_0001>

<bundles_post_ra>
// kernel: tpu_custom_call.1
= control target key start
LH: loop header
LB: loop body
LE: loop exit
PB: predicated region body
PF: predicated region fallthrough
CT: control target
= control target key end

     0   :  { %10 = vsyncpa [#allocation3], 0  ;;  %s5023_s0 = inlined_call_operand.vmem [shape: f32[2,8,32], index: 0, kind: input, shape index: {}]   ;;  %s5024_s1 = inlined_call_operand.vmem [shape: f32[2,8,1], index: 1, kind: input, shape index: {}]   ;;  %s5025_s2 = inlined_call_operand.vmem [shape: f32[2,1,8], index: 2, kind: input, shape index: {}]   ;;  %s5026_s3 = inlined_call_operand.hbm [shape: f32[32,256], index: 3, kind: input, shape index: {}]   ;;  %s5027_s4 = inlined_call_operand.hbm [shape: f32[32,256], index: 4, kind: input, shape index: {}]   ;;  %s5028_s5 = inlined_call_operand.hbm [shape: f32[2,8,32], index: 5, kind: output, shape index: {}]  }
   0x1   :  { %11 = vsyncpa [#allocation6], 0 }
   0x2   :  { %12 = vsyncpa [#allocation4], 0 }
   0x3   :  { %14 = vsyncpa [#allocation4 + $0x1], 0  ;;  %s3926_s18 = smov 0   ;;  %s3928_s19 = smov 0  }
   0x4   :  { %s3930_s20 = smov 0   ;;  %s3932_s21 = smov 0  }
   0x5 LB: > { %s3947_s22 = sadd.s32 4294967295, %s3882_s21   ;;  %s3028_s23 = sadd.s32 4294967294, %s3882_s21   ;;  %s3882_s21 = sphi %s3932_s21, %s5050_s21   ;;  %s3878_s20 = sphi %s3930_s20, %s5049_s20   ;;  %s3874_s19 = sphi %s3928_s19, %s5048_s19   ;;  %s3870_s18 = sphi %s3926_s18, %s5047_s18  }
   0x6   : > { %s3951_s24 = sadd.s32 1, %s3882_s21   ;;  %s147_s25 = sadd.s32 1, %s3878_s20 }
   0x7   : > { %s144_s26 = ssub.s32 %s3882_s21, %s3951_s24  ;;  %p157_p0 = scmp.ne.s32.totalorder %s3878_s20, %s3874_s19 }
   0x8   : > { %p145_p1 = scmp.eq.s32.totalorder %s144_s26, 0  ;;  %p158_p2 = scmp.eq.s32.totalorder %s3947_s22, 1 }
   0x9   : > { %p163_p3 = scmp.ne.s32.totalorder %s3874_s19, %s3870_s18  ;;  %p164_p4 = scmp.eq.s32.totalorder %s3028_s23, 1 }
   0xa   : > { %s3962_s27 = scalar_select %p145_p1, %s3878_s20, %s147_s25  }
   0xb   : > { %p3964_p5 = por %p158_p2, %p157_p0  ;;  %p3968_p6 = por %p164_p4, %p163_p3 }
   0xc   : > { %p3029_p7 = scmp.ge.s32.totalorder %s3882_s21, 1  ;;  %p171_p8 = scmp.lt.s32.totalorder %s3882_s21, 3 }
   0xd   : > { %s5032_s28 = scalar_select %p3964_p5, 1, 0 }
   0xe   : > { %s5033_s29 = scalar_select %p3968_p6, 1, 0 }
   0xf   : > { %p5029_p9 = scmp.eq.s32.totalorder %s3947_s22, 0  ;;  %p3975_p10 = pnand %p3029_p7, %p171_p8 }
  0x10   : > { %s3884_s6 = smov [#allocation2]   ;;  %s3885_s9 = smov [#allocation5]  }
  0x11   : > { %s5034_s30 = scalar_select %p3975_p10, 1, 0 }
  0x12   : > { %s183_s7 = sshll.u32 %s3884_s6, 4  ;;  %p3559_p11 = pneg %p3975_p10  ;;  %s184_s7 = int_to_ptr.vmem [resolvable:$true] %s183_s7 }
  0x13   : > { %s196_s10 = sshll.u32 %s3885_s9, 4  ;;  %s3756_s13 = scalar_lea.hbm %s5026_s3, 1024  ;;  %s3987_s10 = int_to_ptr.vmem [resolvable:$true] %s196_s10 }
  0x14   : > { %p3983_p12 = pnand %p5029_p9, %p3559_p11  ;;  %p3757_p13 = scmp.ne.s32.totalorder %s5026_s3, %s3756_s13 }
  0x15   : > { %p3763_p3 = scmp.lt.u32.totalorder %s3756_s13, %s5026_s3 }
  0x16   : > { %p3758_p0 = pneg %p3983_p12 }
  0x18   : > { %p3759_p1 = pnand %p3758_p0, %p3757_p13 }
  0x1a   : > { %p3760_p2 = pneg %p3759_p1 }
  0x1c   : > { %p3765_p4 = pnand %p3763_p3, %p3760_p2 }
  0x1e   : > { %3768 = shalt.err (!%p3765_p4)
}
  0x1f   : > { %s3769_s23 = scalar_lea.vmem %s184_s7, 1024  ;;  %p3777_p9 = scmp.lt.s32.totalorder %s184_s7, %s184_s7 }
  0x20   : > { %p3770_p7 = scmp.ne.s32.totalorder %s184_s7, %s3769_s23  ;;  %p3778_p6 = scmp.lt.s32.totalorder %s3769_s23, %s3769_s23 }
  0x22   : > { %p3772_p8 = pnand %p3770_p7, %p3758_p0  ;;  %p3779_p5 = por %p3778_p6, %p3777_p9 }
  0x24   : > { %p3773_p11 = pneg %p3772_p8 }
  0x26   : > { %p3780_p10 = pnand %p3779_p5, %p3773_p11 }
  0x28   : > { %3783 = shalt.err (!%p3780_p10)
}
  0x29   : > { %s3886_s25 = smov 256   ;;  %s3887_s26 = smov 16  }
  0x2a   : > { %3562 = dma.hbm_to_vmem [thread:$0]  (!%p3983_p12), %s5026_s3, 1024, %s184_s7, [#allocation3], %s3886_s25, %s3886_s25, %s3887_s26  }
  0x2b   : > { %s3784_s13 = scalar_lea.hbm %s5027_s4, 1024 }
  0x2c   : > { %p3785_p13 = scmp.ne.s32.totalorder %s5027_s4, %s3784_s13  ;;  %p3791_p9 = scmp.lt.u32.totalorder %s3784_s13, %s5027_s4 }
  0x2e   : > { %p3787_p5 = pnand %p3785_p13, %p3758_p0 }
  0x30   : > { %p3788_p6 = pneg %p3787_p5 }
  0x32   : > { %p3793_p10 = pnand %p3791_p9, %p3788_p6 }
  0x34   : > { %3796 = shalt.err (!%p3793_p10)
}
  0x35   : > { %s3797_s7 = scalar_lea.vmem %s3987_s10, 1024  ;;  %p3805_p4 = scmp.lt.s32.totalorder %s3987_s10, %s3987_s10 }
  0x36   : > { %p3798_p1 = scmp.ne.s32.totalorder %s3987_s10, %s3797_s7  ;;  %p3806_p7 = scmp.lt.s32.totalorder %s3797_s7, %s3797_s7 }
  0x38   : > { %p3800_p2 = pnand %p3798_p1, %p3758_p0  ;;  %p3807_p8 = por %p3806_p7, %p3805_p4 }
  0x3a   : > { %p3801_p3 = pneg %p3800_p2 }
  0x3c   : > { %p3808_p11 = pnand %p3807_p8, %p3801_p3 }
  0x3e   : > { %3811 = shalt.err (!%p3808_p11)
}
  0x3f   : > { %3565 = dma.hbm_to_vmem [thread:$0]  (!%p3983_p12), %s5027_s4, 1024, %s3987_s10, [#allocation6], %s3886_s25, %s3886_s25, %s3887_s26  }
  0x40   : > { %p5036_p13 = scmp.ne.s32.totalorder %s5034_s30, 0 }
  0x41   : > { %p5037_p5 = scmp.eq.s32.totalorder (!%p5036_p13), %s3947_s22, 0 }
  0x42   : > { %232 = sbr.rel (%p5036_p13) target bundleno = 7020 (0x1b6c), region = 40 }
  0x49   : > { %3857 = dma.done.wait (%p5037_p5), [#allocation3], 1024   ;;  %p5038_p0 = pmov %p5037_p5 }
  0x4b   : > { %3859 = vsyncadd (%p5038_p0), [#allocation3], 4294966272  ;;  %p5039_p6 = pmov %p5038_p0 }
  0x4c   : > { %p5040_p9 = pmov %p5038_p0 }
  0x4d   : > { %3861 = dma.done.wait (%p5039_p6), [#allocation6], 1024  }
  0x4e   : > { %3863 = vsyncadd (%p5040_p9), [#allocation6], 4294966272  ;;  %p270_p10 = scmp.lt.s32.totalorder %s3947_s22, 1  ;;  %v3888_v0 = vmov 0   ;;  %v3889_v1 = vmov 0.0   ;;  %vm326_vm0 = vcmask 261120   ;;  %v300_v53 = vlaneseq }
  0x4f   : > { %3618 = vset.pattern.permute.xlu0 %v3888_v0  ;;  %406 = vmatprep.mubr.f32.mxu0 %v3889_v1  ;;  %v285_v12 = vld [vmem:[#allocation2 + $0x8] sm:$0xff]  ;;  %v287_v13 = vld [vmem:[#allocation2 + $0x18] sm:$0xff]  ;;  %v284_v14 = vld [vmem:[#allocation2] sm:$0xff]  ;;  %s3890_s13 = smov 96   ;;  %s3891_s14 = smov 32   ;;  %vm579_vm5 = vcmask 64512  }
  0x50   : > { %s4048_s8 = scalar_select %p270_p10, %s3947_s22, 1  ;;  %v4073_v15 = vpack.c.bf16 %v287_v13, %v285_v12  ;;  %v286_v16 = vld [vmem:[#allocation2 + $0x10] sm:$0xff]  ;;  %v289_v17 = vld [vmem:[#allocation2 + $0x28] sm:$0xff]  ;;  %v291_v18 = vld [vmem:[#allocation2 + $0x38] sm:$0xff]  ;;  %v301_v54 = vshrl.u32 %v300_v53, 7  ;;  %v303_v55 = vand.u32 127, %v300_v53 }
  0x51   : > { %v4075_v19 = vpack.c.bf16 %v286_v16, %v284_v14  ;;  %v4077_v20 = vpack.c.bf16 %v291_v18, %v289_v17  ;;  %v288_v21 = vld [vmem:[#allocation2 + $0x20] sm:$0xff]  ;;  %v290_v22 = vld [vmem:[#allocation2 + $0x30] sm:$0xff]  ;;  %v293_v23 = vld [vmem:[#allocation5 + $0x8] sm:$0xff]  ;;  %s3892_s15 = smov 64   ;;  %vm3894_vm6 = vmmov 0   ;;  %s267_s23 = sand.u32 1, %s3874_s19  }
  0x52   : > { %s3037_s30 = sshll.u32 %s4048_s8, 3  ;;  %3390 = vmatprep.subr.bf16.mxu0 %v4073_v15  ;;  %v295_v24 = vld [vmem:[#allocation5 + $0x18] sm:$0xff]  ;;  %v4081_v25 = vpack.c.bf16 %v290_v22, %v288_v21  ;;  %v292_v28 = vld [vmem:[#allocation5] sm:$0xff]  ;;  %v294_v29 = vld [vmem:[#allocation5 + $0x10] sm:$0xff]  ;;  %vm306_vm1 = vcmp.eq.s32.totalorder %v303_v55, %v301_v54  ;;  %s280_s7 = scalar_lea.vmem %s5025_s2, %s4048_s8  ;;  %vm4178_vm3 = vcmp.lt.s32.totalorder %v303_v55, %v301_v54  ;;  %vm4182_vm4 = vcmp.gt.s32.totalorder %v303_v55, %v301_v54 }
  0x53   : > { %s277_s26 = scalar_lea.vmem %s5024_s1, %s3037_s30  ;;  %s4058_s12 = scalar_lea.vmem %s5023_s0, %s3037_s30  ;;  %3392 = vmatpush1.bf16.msra.mxu0 %v4075_v19  ;;  %v4084_v26 = vpack.c.bf16 %v295_v24, %v293_v23  ;;  %v297_v31 = vld [vmem:[#allocation5 + $0x28] sm:$0xff]  ;;  %v299_v32 = vld [vmem:[#allocation5 + $0x38] sm:$0xff]  ;;  %v4090_v34 = vpack.c.bf16 %v294_v29, %v292_v28  ;;  %v296_v37 = vld [vmem:[#allocation5 + $0x20] sm:$0xff]  ;;  %v3039_v57 = vsel %vm306_vm1, 1.0, %v3889_v1 }
  0x54   : > { %v282_v2 = vld [vmem:[%s277_s26] sm:$0xff]  ;;  %3394 = vmatprep.subr.bf16.mxu0 %v4077_v20  ;;  %v4094_v36 = vpack.c.bf16 %v299_v32, %v297_v31  ;;  %v298_v38 = vld [vmem:[#allocation5 + $0x30] sm:$0xff]  ;;  %v4171_v60 = vmul.f32 1e+09, %v3039_v57  ;;  %s3036_s6 = sshll.u32 %s267_s23, 3  ;;  %s3086_s8 = sshll.u32 %s3947_s22, 7 }
  0x55   : > { %312 = vperm.xlu0 %3618, %v282_v2   ;;  %v4061_v3 = vld [vmem:[%s4058_s12] sm:$0xff]  ;;  %v4100_v39 = vpack.c.bf16 %v298_v38, %v296_v37  ;;  %s269_s30 = scalar_lea.vmem [#allocation7], %s3036_s6  ;;  %s4980_s9 = scalar_lea.hbm %s5028_s5, %s3086_s8 }
  0x56   : > { %v3040_v59 = vld [vmem:[%s280_s7] ss:$0 sm:$0xff]  ;;  %v324_v63 = vsub.f32 1.0, %v4171_v60  ;;  %s2926_s10 = sshll.u32 %s269_s30, 4  ;;  %s2913_s22 = scalar_lea.sflag [#allocation4], %s267_s23  ;;  %s4982_s10 = int_to_ptr.vmem [resolvable:$true] %s2926_s10 }
  0x57   : > { %3396 = vmatpush1.bf16.msra.mxu0 %v4081_v25  ;;  %s3812_s11 = scalar_lea.vmem %s4982_s10, 128  ;;  %p5045_p1 = scmp.ne.s32.totalorder %s5032_s28, 0 }
  0x58   : > { %3398 = vmatprep.subr.bf16.mxu0 %v4084_v26  ;;  %p3813_p12 = scmp.ne.s32.totalorder %s4982_s10, %s3812_s11 }
  0x5a   : > { %p3814_p2 = pnand %p3813_p12, %p5045_p1 }
  0x5c   : > { %p3815_p3 = pneg %p3814_p2 }
  0xd4   : > { %v4063_v4 = vpop.permute.xlu0 %312 }
  0xd5   : > { %v4067_v5 = vmul.f32 %v4063_v4, %v4061_v3  ;;  %v4174_v61 = vmul.f32 %v3040_v59, %v4063_v4 }
  0xd7   : > { %v327_v6 = vsel %vm326_vm0, %v4067_v5, -inf  ;;  %vm322_vm2 = vcmp.lt.f32.partialorder %v4174_v61, 0.5 }
  0xd8   : > { %328 = vmax.xlane.f32.xlu0 %v327_v6 }
 0x165   : > { %v329_v7 = vpop.xlane.xlu0 %328 }
 0x166   : > { %v330_v8 = vsub.f32 %v4067_v5, %v329_v7  ;;  %v325_v7 = vsel %vm322_vm2, -1e+09, %v324_v63 }
 0x167   : > { %v562_v13 = vmul.f32 0.0, %v325_v7 }
 0x168   : > { %v331_v9 = vmul.f32 1.442695, %v330_v8 }
 0x16a   : > { %3675 = vpow2.f32 %v331_v9 }
 0x174   : > { %v3676_v10 = vpop.eup %3675 }
 0x175   : > { %v333_v11 = vsel %vm326_vm0, %v3676_v10, 0.0 }
 0x176   : > { %334 = vadd.xlane.f32.xlu1 %v333_v11 }
 0x203   : > { %v335_v27 = vpop.xlane.xlu1 %334 }
 0x204   : > { %3677 = vrcp.f32 %v335_v27 }
 0x20e   : > { %v3678_v30 = vpop.eup %3677 }
 0x20f   : > { %v4088_v33 = vmul.f32 %v3678_v30, %v3676_v10 }
 0x211   : > { %v338_v35 = vmul.f32 %v4088_v33, %v4063_v4 }
 0x213   : > { %3041 = vmatmul.mubr.msk.f32.vlgmr.msra.gmra.mrb[0].mxu0 %vm326_vm0, %v338_v35  ;;  %3193 = vmatprep.subr.msk.mxu1 %vm326_vm0, %v338_v35 }
 0x214   : > { %3400 = vmatpush1.bf16.msra.mxu0 %v4090_v34  ;;  %3194 = vmatpush3.xpose.msk.msra.mxu1 %vm326_vm0, %v338_v35 }
 0x215   : > { %3402 = vmatprep.subr.bf16.mxu0 %v4094_v36  ;;  %832 = vmatprep.mubr.f32.mxu0 %v3889_v1 }
 0x218   : > { %3404 = vmatpush1.bf16.msra.mxu0 %v4100_v39 }
 0x219   : > { %3430 = vmatprep.subr.bf16.mxu0 %v4073_v15 }
 0x21b   : > { %3051 = vmatmul.mubr.msk.f32.vlgmr.msra.gmra.mrb[2].mxu0 %vm326_vm0, %v338_v35 }
 0x21c   : > { %3432 = vmatpush1.bf16.msra.mxu0 %v4075_v19  ;;  %1045 = vmatprep.mubr.f32.mxu0 %v3889_v1 }
 0x21d   : > { %3434 = vmatprep.subr.bf16.mxu0 %v4077_v20 }
 0x220   : > { %3436 = vmatpush1.bf16.msra.mxu0 %v4081_v25 }
 0x221   : > { %3438 = vmatprep.subr.bf16.mxu0 %v4084_v26 }
 0x2e6   : > { %v4112_v40 = vpop.f32.mrb[0].mxu0 }
 0x2e7   : > { %414 = vrot.lane.b32.xlu1 %v4112_v40, %s3890_s13  ;;  %v4116_v41 = vpop.f32.mrb[1].mxu0  ;;  %3195 = vmatprep.mubr.msk.f32.mxu1 %vm326_vm0, %v4112_v40 }
 0x2e8   : > { %430 = vrot.lane.b32.xlu0 %v4116_v41, %s3891_s14 }
 0x2eb   : > { %417 = vrot.lane.b32.xlu1 %v4112_v40, %s3892_s15 }
 0x2ee   : > { %v4124_v42 = vpop.f32.mrb[2].mxu0 }
 0x2ef   : > { %v4126_v43 = vpop.f32.mrb[3].mxu0  ;;  %420 = vrot.lane.b32.xlu1 %v4112_v40, %s3891_s14 }
 0x2f3   : > { %424 = vrot.lane.b32.xlu1 %v4116_v41, %s3890_s13 }
 0x2f7   : > { %427 = vrot.lane.b32.xlu1 %v4116_v41, %s3892_s15 }
 0x359   : > { %v4134_v44 = vpop.permute.xlu1 %414 }
 0x35a   : > { %v3418_v45 = vpack.c.bf16 %v4134_v44, %v4112_v40  ;;  %3196 = vmatmul.mubr.msk.f32.vlgmr.msra.gmra.mrb[0].mxu1 %vm326_vm0, %v4134_v44  ;;  %v4160_v52 = vpop.permute.xlu0 %430 }
 0x35d   : > { %v4140_v46 = vpop.permute.xlu1 %417 }
 0x35e   : > { %3198 = vmatprep.mubr.msk.f32.mxu1 %vm326_vm0, %v4140_v46 }
 0x361   : > { %v4144_v47 = vpop.permute.xlu1 %420 }
 0x362   : > { %v3421_v48 = vpack.c.bf16 %v4144_v47, %v4140_v46  ;;  %3199 = vmatmul.mubr.msk.f32.gmra.mrb[2].mxu1 %vm326_vm0, %v4144_v47 }
 0x363   : > { %3201 = vmatprep.mubr.msk.f32.mxu1 %vm326_vm0, %v4116_v41 }
 0x365   : > { %v4152_v49 = vpop.permute.xlu1 %424 }
 0x366   : > { %v3424_v50 = vpack.c.bf16 %v4152_v49, %v4116_v41  ;;  %3202 = vmatmul.mubr.msk.f32.gmra.mrb[4].mxu1 %vm326_vm0, %v4152_v49 }
 0x369   : > { %v4158_v51 = vpop.permute.xlu1 %427 }
 0x36a   : > { %3204 = vmatprep.mubr.msk.f32.mxu1 %vm326_vm0, %v4158_v51  ;;  %v3427_v44 = vpack.c.bf16 %v4160_v52, %v4158_v51  ;;  %v961_v51 = vmul.f32 0.0, %v4067_v5 }
 0x36b   : > { %3205 = vmatmul.mubr.msk.f32.gmra.mrb[6].mxu1 %vm326_vm0, %v4160_v52 }
 0x36c   : > { %3239 = vmatprep.mubr.msk.f32.mxu1 %vm3894_vm6, %v3889_v1 }
 0x42d   : > { %v3197_v56 = vpop.f32.mrb[0].mxu1 }
 0x42e   : > { %v515_v58 = vpop.f32.mrb[1].mxu1 }
 0x435   : > { %v3200_v62 = vpop.f32.mrb[2].mxu1 }
 0x436   : > { %v525_v0 = vpop.f32.mrb[3].mxu1 }
 0x439   : > { %v3203_v8 = vpop.f32.mrb[4].mxu1 }
 0x43a   : > { %v555_v9 = vsel %vm4178_vm3, %v3203_v8, 0.0  ;;  %v535_v10 = vpop.f32.mrb[5].mxu1 }
 0x43b   : > { %v559_v11 = vsel %vm4182_vm4, %v3197_v56, %v555_v9  ;;  %v554_v12 = vsel %vm4178_vm3, %v535_v10, 0.0 }
 0x43c   : > { %v564_v14 = vmul.f32 32.0, %v559_v11  ;;  %v558_v16 = vsel %vm4182_vm4, %v515_v58, %v554_v12 }
 0x43d   : > { %v563_v17 = vmul.f32 32.0, %v558_v16 }
 0x43e   : > { %v568_v18 = vadd.f32 %v564_v14, %v562_v13  ;;  %v3206_v21 = vpop.f32.mrb[6].mxu1 }
 0x43f   : > { %v567_v22 = vadd.f32 %v563_v17, %v562_v13  ;;  %v557_v23 = vsel %vm4178_vm3, %v3206_v21, 0.0  ;;  %v545_v24 = vpop.f32.mrb[7].mxu1 }
 0x440   : > { %v561_v27 = vsel %vm4182_vm4, %v3200_v62, %v557_v23  ;;  %v556_v28 = vsel %vm4178_vm3, %v545_v24, 0.0  ;;  %v572_v29 = vsub.f32 %v568_v18, %v4171_v60 }
 0x441   : > { %v566_v30 = vmul.f32 32.0, %v561_v27  ;;  %v560_v31 = vsel %vm4182_vm4, %v525_v0, %v556_v28  ;;  %v571_v32 = vsub.f32 %v567_v22, %v4171_v60 }
 0x442   : > { %v565_v35 = vmul.f32 32.0, %v560_v31  ;;  %v4208_v37 = vsel %vm322_vm2, -1e+09, %v572_v29 }
 0x443   : > { %v570_v38 = vadd.f32 %v566_v30, %v562_v13  ;;  %v583_v53 = vsel %vm579_vm5, %v4208_v37, -inf  ;;  %v4214_v54 = vsel %vm322_vm2, -1e+09, %v571_v32  ;;  %v3893_v32 = vmov 0.0|0.0  }
 0x444   : > { %v569_v55 = vadd.f32 %v565_v35, %v562_v13  ;;  %584 = vmax.xlane.f32.xlu0 %v583_v53  ;;  %v580_v56 = vsel %vm579_vm5, %v4214_v54, -inf  ;;  %3405 = vmatprep.subr.bf16.mxu1 %v3893_v32 }
 0x445   : > { %581 = vmax.xlane.f32.xlu1 %v580_v56  ;;  %v574_v58 = vsub.f32 %v570_v38, %v4171_v60 }
 0x446   : > { %v573_v57 = vsub.f32 %v569_v55, %v4171_v60 }
 0x447   : > { %v4228_v63 = vsel %vm322_vm2, -1e+09, %v574_v58 }
 0x448   : > { %v4222_v59 = vsel %vm322_vm2, -1e+09, %v573_v57  ;;  %v589_v0 = vsel %vm579_vm5, %v4228_v63, -inf }
 0x449   : > { %v586_v62 = vsel %vm579_vm5, %v4222_v59, -inf }
 0x44a   : > { %587 = vmax.xlane.f32.xlu1 %v586_v62 }
 0x44e   : > { %590 = vmax.xlane.f32.xlu1 %v589_v0 }
 0x4d1   : > { %v585_v7 = vpop.xlane.xlu0 %584 }
 0x4d2   : > { %v593_v8 = vsub.f32 %v4208_v37, %v585_v7  ;;  %v582_v9 = vpop.xlane.xlu1 %581 }
 0x4d3   : > { %v592_v10 = vsub.f32 %v4214_v54, %v582_v9 }
 0x4d4   : > { %v598_v11 = vmul.f32 1.442695, %v593_v8 }
 0x4d5   : > { %v596_v12 = vmul.f32 1.442695, %v592_v10 }
 0x4d6   : > { %3679 = vpow2.f32 %v598_v11 }
 0x4d7   : > { %v588_v13 = vpop.xlane.xlu1 %587  ;;  %3681 = vpow2.f32 %v596_v12 }
 0x4d8   : > { %v594_v14 = vsub.f32 %v4222_v59, %v588_v13 }
 0x4da   : > { %v600_v16 = vmul.f32 1.442695, %v594_v14 }
 0x4db   : > { %v591_v17 = vpop.xlane.xlu1 %590 }
 0x4dc   : > { %3683 = vpow2.f32 %v600_v16  ;;  %v595_v18 = vsub.f32 %v4228_v63, %v591_v17 }
 0x4de   : > { %v602_v21 = vmul.f32 1.442695, %v595_v18 }
 0x4e0   : > { %v3680_v22 = vpop.eup %3679  ;;  %3685 = vpow2.f32 %v602_v21 }
 0x4e1   : > { %v607_v23 = vsel %vm579_vm5, %v3680_v22, 0.0  ;;  %v3682_v24 = vpop.eup %3681 }
 0x4e2   : > { %608 = vadd.xlane.f32.xlu1 %v607_v23  ;;  %v604_v27 = vsel %vm579_vm5, %v3682_v24, 0.0 }
 0x4e6   : > { %v3684_v28 = vpop.eup %3683  ;;  %605 = vadd.xlane.f32.xlu1 %v604_v27 }
 0x4e7   : > { %v610_v29 = vsel %vm579_vm5, %v3684_v28, 0.0 }
 0x4e8   : > { %611 = vadd.xlane.f32.xlu0 %v610_v29 }
 0x4ea   : > { %v3686_v30 = vpop.eup %3685 }
 0x4eb   : > { %v613_v31 = vsel %vm579_vm5, %v3686_v30, 0.0 }
 0x4ec   : > { %614 = vadd.xlane.f32.xlu1 %v613_v31 }
 0x4fd   : > { %843 = vrot.lane.b32.xlu1 %v4124_v42, %s3892_s15 }
 0x4fe   : > { %840 = vrot.lane.b32.xlu0 %v4124_v42, %s3890_s13 }
 0x501   : > { %846 = vrot.lane.b32.xlu1 %v4124_v42, %s3891_s14 }
 0x502   : > { %850 = vrot.lane.b32.xlu0 %v4126_v43, %s3890_s13 }
 0x505   : > { %853 = vrot.lane.b32.xlu1 %v4126_v43, %s3892_s15 }
 0x56f   : > { %v609_v35 = vpop.xlane.xlu1 %608 }
 0x570   : > { %3687 = vrcp.f32 %v609_v35 }
 0x573   : > { %v606_v38 = vpop.xlane.xlu1 %605 }
 0x574   : > { %3689 = vrcp.f32 %v606_v38 }
 0x575   : > { %v612_v53 = vpop.xlane.xlu0 %611 }
 0x576   : > { %3691 = vrcp.f32 %v612_v53 }
 0x579   : > { %v841_v55 = vpop.permute.xlu0 %840  ;;  %v615_v56 = vpop.xlane.xlu1 %614 }
 0x57a   : > { %v3406_v57 = vpack.c.bf16 %v841_v55, %v4124_v42  ;;  %3693 = vrcp.f32 %v615_v56  ;;  %v3688_v58 = vpop.eup %3687 }
 0x57b   : > { %v4253_v7 = vmul.f32 %v3688_v58, %v3680_v22 }
 0x57c   : > { %3407 = vmatpush3.bf16.msra.mxu1 %v3406_v57 }
 0x57d   : > { %v844_v62 = vpop.permute.xlu1 %843  ;;  %3408 = vmatprep.subr.bf16.mxu1 %v3893_v32  ;;  %v851_v13 = vpop.permute.xlu0 %850  ;;  %v765_v46 = vsel %vm4178_vm3, %v4253_v7, 0.0 }
 0x57e   : > { %v3690_v0 = vpop.eup %3689  ;;  %v3412_v17 = vpack.c.bf16 %v851_v13, %v4126_v43 }
 0x57f   : > { %v4255_v8 = vmul.f32 %v3690_v0, %v3682_v24  ;;  %v761_v0 = vsel %vm4182_vm4, %v4253_v7, 0.0 }
 0x580   : > { %v3692_v11 = vpop.eup %3691 }
 0x581   : > { %v847_v9 = vpop.permute.xlu1 %846  ;;  %v3619_v10 = vpack.i.bf16 %v4253_v7, %v4255_v8  ;;  %v4260_v14 = vmul.f32 %v3692_v11, %v3684_v28  ;;  %v764_v41 = vsel %vm4178_vm3, %v4255_v8, 0.0 }
 0x582   : > { %v3409_v12 = vpack.c.bf16 %v847_v9, %v844_v62  ;;  %v760_v62 = vsel %vm4182_vm4, %v4255_v8, 0.0 }
 0x583   : > { %3620 = vxpose.xlu0.b32.start.end [1/1] (short) (narrow) %v3619_v10, 8  ;;  %v762_v40 = vsel %vm4182_vm4, %v4260_v14, 0.0  ;;  %v766_v47 = vsel %vm4178_vm3, %v4260_v14, 0.0 }
 0x584   : > { %v3694_v42 = vpop.eup %3693  ;;  %3410 = vmatpush3.bf16.msra.mxu1 %v3409_v12 }
 0x585   : > { %3411 = vmatprep.subr.bf16.mxu1 %v3893_v32  ;;  %v4262_v16 = vmul.f32 %v3694_v42, %v3686_v30  ;;  %v854_v23 = vpop.permute.xlu1 %853 }
 0x587   : > { %v3626_v18 = vpack.i.bf16 %v4262_v16, %v4260_v14 }
 0x588   : > { %3413 = vmatpush3.bf16.msra.mxu1 %v3412_v17 }
 0x589   : > { %3627 = vxpose.xlu1.b32.start.end [1/1] (short) (narrow) %v3626_v18, 8  ;;  %3414 = vmatprep.subr.bf16.mxu1 %v3893_v32 }
 0x5ac   : > { %856 = vrot.lane.b32.xlu0 %v4126_v43, %s3891_s14 }
 0x603   : > { %v3621_v21 = vpop.trf.xlu0 }
 0x604   : > { %v3622_v22 = vunpack.i.l.bf16 %v3621_v21  ;;  %v3625_v27 = vunpack.i.h.bf16 %v3621_v21 }
 0x606   : > { %v752_v24 = vsel %vm4178_vm3, %v3622_v22, 0.0  ;;  %v753_v29 = vsel %vm4178_vm3, %v3625_v27, 0.0  ;;  %v756_v38 = vsel %vm4182_vm4, %v3622_v22, 0.0  ;;  %v757_v53 = vsel %vm4182_vm4, %v3625_v27, 0.0 }
 0x607   : > { %859 = vxpose.xlu1.b32.start [1/16] (narrow) %v752_v24, 8 }
 0x609   : > { %v3628_v28 = vpop.trf.xlu1 }
 0x60a   : > { %v3629_v30 = vunpack.i.l.bf16 %v3628_v28  ;;  %v3632_v31 = vunpack.i.h.bf16 %v3628_v28 }
 0x60b   : > { %860 = vxpose.xlu1.b32.cont [2/16] (narrow) %v753_v29, 8 }
 0x60c   : > { %v754_v43 = vsel %vm4178_vm3, %v3629_v30, 0.0  ;;  %v755_v35 = vsel %vm4178_vm3, %v3632_v31, 0.0  ;;  %v758_v56 = vsel %vm4182_vm4, %v3629_v30, 0.0  ;;  %v759_v58 = vsel %vm4182_vm4, %v3632_v31, 0.0 }
 0x60f   : > { %861 = vxpose.xlu1.b32.cont [3/16] (narrow) %v754_v43, 8 }
 0x613   : > { %862 = vxpose.xlu1.b32.cont [4/16] (narrow) %v755_v35, 8 }
 0x617   : > { %863 = vxpose.xlu1.b32.cont [5/16] (narrow) %v756_v38, 8 }
 0x61b   : > { %864 = vxpose.xlu1.b32.cont [6/16] (narrow) %v757_v53, 8 }
 0x61e   : > { %v857_v55 = vpop.permute.xlu0 %856 }
 0x61f   : > { %v3415_v57 = vpack.c.bf16 %v857_v55, %v854_v23  ;;  %865 = vxpose.xlu1.b32.cont [7/16] (narrow) %v758_v56, 8 }
 0x621   : > { %3416 = vmatpush3.bf16.msra.mxu1 %v3415_v57 }
 0x622   : > { %3417 = vmatprep.subr.bf16.mxu1 %v3893_v32 }
 0x623   : > { %866 = vxpose.xlu1.b32.cont [8/16] (narrow) %v759_v58, 8 }
 0x625   : > { %3419 = vmatpush3.bf16.msra.mxu1 %v3418_v45  ;;  %v763_v45 = vsel %vm4182_vm4, %v4262_v16, 0.0 }
 0x626   : > { %3420 = vmatprep.subr.bf16.mxu1 %v3893_v32 }
 0x627   : > { %867 = vxpose.xlu1.b32.cont [9/16] (narrow) %v760_v62, 8 }
 0x629   : > { %3422 = vmatpush3.bf16.msra.mxu1 %v3421_v48  ;;  %v767_v48 = vsel %vm4178_vm3, %v4262_v16, 0.0 }
 0x62a   : > { %3423 = vmatprep.subr.bf16.mxu1 %v3893_v32 }
 0x62b   : > { %868 = vxpose.xlu1.b32.cont [10/16] (narrow) %v761_v0, 8 }
 0x62d   : > { %3425 = vmatpush3.bf16.msra.mxu1 %v3424_v50 }
 0x62e   : > { %3426 = vmatprep.subr.bf16.mxu1 %v3893_v32 }
 0x62f   : > { %869 = vxpose.xlu1.b32.cont [11/16] (narrow) %v762_v40, 8 }
 0x631   : > { %3428 = vmatpush3.bf16.msra.mxu1 %v3427_v44 }
 0x633   : > { %870 = vxpose.xlu1.b32.cont [12/16] (narrow) %v763_v45, 8 }
 0x637   : > { %871 = vxpose.xlu1.b32.cont [13/16] (narrow) %v764_v41, 8 }
 0x63b   : > { %872 = vxpose.xlu1.b32.cont [14/16] (narrow) %v765_v46, 8 }
 0x63f   : > { %873 = vxpose.xlu1.b32.cont [15/16] (narrow) %v766_v47, 8 }
 0x643   : > { %874 = vxpose.xlu1.b32.end [16/16] (narrow) %v767_v48, 8  ;;  %v1202_v48 = vmul.f32 0.0, %v4208_v37 }
 0x687   : > { %v875_v49 = vpop.trf.xlu1 }
 0x688   : > { %3240 = vmatmul.mubr.f32.vlgmr.msra.gmra.mrb[8].mxu1 %v875_v49 }
 0x75b   : > { %v957_v50 = vpop.f32.mrb[8].mxu1 }
 0x75c   : > { %v962_v52 = vadd.f32 %v957_v50, %v4061_v3  ;;  %v3241_v9 = vpop.f32.mrb[9].mxu1  ;;  %v964_v3 = vmul.f32 0.0, %v4088_v33 }
 0x75e   : > { %v4329_v10 = vadd.f32 %v962_v52, %v961_v51  ;;  %v1201_v51 = vmul.f32 0.0, %v4214_v54 }
 0x760   : > { %v965_v11 = vsel %vm326_vm0, %v4329_v10, -inf }
 0x761   : > { %966 = vmax.xlane.f32.xlu0 %v965_v11 }
 0x7ee   : > { %v967_v12 = vpop.xlane.xlu0 %966 }
 0x7ef   : > { %v968_v13 = vsub.f32 %v4329_v10, %v967_v12 }
 0x7f1   : > { %v969_v42 = vmul.f32 1.442695, %v968_v13 }
 0x7f3   : > { %3695 = vpow2.f32 %v969_v42 }
 0x7fd   : > { %v3696_v17 = vpop.eup %3695 }
 0x7fe   : > { %v971_v18 = vsel %vm326_vm0, %v3696_v17, 0.0 }
 0x7ff   : > { %972 = vadd.xlane.f32.xlu0 %v971_v18 }
 0x88c   : > { %v973_v21 = vpop.xlane.xlu0 %972 }
 0x88d   : > { %3697 = vrcp.f32 %v973_v21 }
 0x897   : > { %v3698_v5 = vpop.eup %3697 }
 0x898   : > { %v975_v22 = vmul.f32 %v3698_v5, %v3696_v17 }
 0x89a   : > { %v4336_v23 = vadd.f32 %v975_v22, %v964_v3  ;;  %v1204_v3 = vmul.f32 0.0, %v4228_v63 }
 0x89c   : > { %v977_v24 = vmul.f32 %v4336_v23, %v4063_v4 }
 0x89e   : > { %3052 = vmatmul.mubr.msk.f32.vlgmr.msra.gmra.mrb[4].mxu0 %vm326_vm0, %v977_v24  ;;  %3242 = vmatprep.subr.msk.mxu1 %vm326_vm0, %v977_v24 }
 0x89f   : > { %3440 = vmatpush1.bf16.msra.mxu0 %v4090_v34  ;;  %3243 = vmatpush3.xpose.msk.msra.mxu1 %vm326_vm0, %v977_v24 }
 0x8a0   : > { %3442 = vmatprep.subr.bf16.mxu0 %v4094_v36  ;;  %1481 = vmatprep.mubr.f32.mxu0 %v3889_v1 }
 0x8a1   : > { %3445 = vmatprep.subr.bf16.mxu1 %v3893_v32 }
 0x8a3   : > { %3444 = vmatpush1.bf16.msra.mxu0 %v4100_v39 }
 0x8a4   : > { %3470 = vmatprep.subr.bf16.mxu0 %v4073_v15 }
 0x8a6   : > { %3062 = vmatmul.mubr.msk.f32.vlgmr.msra.gmra.mrb[6].mxu0 %vm326_vm0, %v977_v24 }
 0x8a7   : > { %3472 = vmatpush1.bf16.msra.mxu0 %v4075_v19  ;;  %1694 = vmatprep.mubr.f32.mxu0 %v3889_v1 }
 0x8a8   : > { %3474 = vmatprep.subr.bf16.mxu0 %v4077_v20 }
 0x8ab   : > { %3476 = vmatpush1.bf16.msra.mxu0 %v4081_v25 }
 0x971   : > { %v4354_v33 = vpop.f32.mrb[4].mxu0 }
 0x972   : > { %1053 = vrot.lane.b32.xlu0 %v4354_v33, %s3890_s13  ;;  %v4358_v27 = vpop.f32.mrb[5].mxu0  ;;  %3244 = vmatprep.mubr.msk.f32.mxu1 %vm326_vm0, %v4354_v33 }
 0x976   : > { %1056 = vrot.lane.b32.xlu0 %v4354_v33, %s3892_s15 }
 0x979   : > { %v4364_v28 = vpop.f32.mrb[6].mxu0 }
 0x97a   : > { %v4366_v29 = vpop.f32.mrb[7].mxu0  ;;  %1059 = vrot.lane.b32.xlu0 %v4354_v33, %s3891_s14 }
 0x97e   : > { %1063 = vrot.lane.b32.xlu0 %v4358_v27, %s3890_s13 }
 0x982   : > { %1066 = vrot.lane.b32.xlu0 %v4358_v27, %s3892_s15 }
 0x986   : > { %1069 = vrot.lane.b32.xlu0 %v4358_v27, %s3891_s14 }
 0x9e4   : > { %v4376_v30 = vpop.permute.xlu0 %1053 }
 0x9e5   : > { %v3458_v43 = vpack.c.bf16 %v4376_v30, %v4354_v33  ;;  %3245 = vmatmul.mubr.msk.f32.vlgmr.msra.gmra.mrb[10].mxu1 %vm326_vm0, %v4376_v30 }
 0x9e8   : > { %v4382_v31 = vpop.permute.xlu0 %1056 }
 0x9e9   : > { %3247 = vmatprep.mubr.msk.f32.mxu1 %vm326_vm0, %v4382_v31 }
 0x9ec   : > { %v4386_v35 = vpop.permute.xlu0 %1059 }
 0x9ed   : > { %v3461_v38 = vpack.c.bf16 %v4386_v35, %v4382_v31  ;;  %3248 = vmatmul.mubr.msk.f32.gmra.mrb[12].mxu1 %vm326_vm0, %v4386_v35 }
 0x9ee   : > { %3250 = vmatprep.mubr.msk.f32.mxu1 %vm326_vm0, %v4358_v27 }
 0x9f0   : > { %v4394_v53 = vpop.permute.xlu0 %1063 }
 0x9f1   : > { %v3464_v55 = vpack.c.bf16 %v4394_v53, %v4358_v27  ;;  %3251 = vmatmul.mubr.msk.f32.gmra.mrb[14].mxu1 %vm326_vm0, %v4394_v53 }
 0x9f4   : > { %v4400_v56 = vpop.permute.xlu0 %1066 }
 0x9f5   : > { %3253 = vmatprep.mubr.msk.f32.mxu1 %vm326_vm0, %v4400_v56 }
 0x9f8   : > { %v4404_v57 = vpop.permute.xlu0 %1069 }
 0x9f9   : > { %3254 = vmatmul.mubr.msk.f32.gmra.mrb[16].mxu1 %vm326_vm0, %v4404_v57  ;;  %v3467_v33 = vpack.c.bf16 %v4404_v57, %v4400_v56  ;;  %v1610_v57 = vmul.f32 0.0, %v4329_v10 }
 0x9fa   : > { %3288 = vmatprep.mubr.msk.f32.mxu1 %vm3894_vm6, %v3889_v1 }
 0xab8   : > { %v3246_v58 = vpop.f32.mrb[10].mxu1 }
 0xab9   : > { %v1154_v62 = vpop.f32.mrb[11].mxu1 }
 0xac0   : > { %v3249_v0 = vpop.f32.mrb[12].mxu1 }
 0xac1   : > { %v1164_v40 = vpop.f32.mrb[13].mxu1 }
 0xac4   : > { %v3252_v44 = vpop.f32.mrb[14].mxu1 }
 0xac5   : > { %v1194_v45 = vsel %vm4178_vm3, %v3252_v44, 0.0  ;;  %v1174_v41 = vpop.f32.mrb[15].mxu1 }
 0xac6   : > { %v1198_v46 = vsel %vm4182_vm4, %v3246_v58, %v1194_v45  ;;  %v1193_v47 = vsel %vm4178_vm3, %v1174_v41, 0.0 }
 0xac7   : > { %v1206_v49 = vmul.f32 32.0, %v1198_v46  ;;  %v1197_v50 = vsel %vm4182_vm4, %v1154_v62, %v1193_v47  ;;  %v1203_v62 = vmul.f32 0.0, %v4222_v59 }
 0xac8   : > { %v1205_v52 = vmul.f32 32.0, %v1197_v50 }
 0xac9   : > { %v1210_v9 = vadd.f32 %v1206_v49, %v1202_v48 }
 0xaca   : > { %v1209_v11 = vadd.f32 %v1205_v52, %v1201_v51 }
 0xacb   : > { %v1214_v12 = vsub.f32 %v1210_v9, %v4171_v60 }
 0xacc   : > { %v3255_v13 = vpop.f32.mrb[16].mxu1  ;;  %v1213_v42 = vsub.f32 %v1209_v11, %v4171_v60 }
 0xacd   : > { %v1196_v17 = vsel %vm4178_vm3, %v3255_v13, 0.0  ;;  %v1184_v18 = vpop.f32.mrb[17].mxu1  ;;  %v4426_v37 = vsel %vm322_vm2, -1e+09, %v1214_v12 }
 0xace   : > { %v1200_v21 = vsel %vm4182_vm4, %v3249_v0, %v1196_v17  ;;  %v1195_v54 = vsel %vm4178_vm3, %v1184_v18, 0.0  ;;  %v1228_v5 = vsel %vm579_vm5, %v4426_v37, -inf  ;;  %v4439_v58 = vsel %vm322_vm2, -1e+09, %v1213_v42 }
 0xacf   : > { %v1208_v22 = vmul.f32 32.0, %v1200_v21  ;;  %v1199_v24 = vsel %vm4182_vm4, %v1164_v40, %v1195_v54  ;;  %1229 = vmax.xlane.f32.xlu1 %v1228_v5  ;;  %v1225_v44 = vsel %vm579_vm5, %v4439_v58, -inf }
 0xad0   : > { %v1207_v0 = vmul.f32 32.0, %v1199_v24  ;;  %1226 = vmax.xlane.f32.xlu0 %v1225_v44 }
 0xad1   : > { %v1212_v45 = vadd.f32 %v1208_v22, %v1204_v3 }
 0xad2   : > { %v1211_v41 = vadd.f32 %v1207_v0, %v1203_v62 }
 0xad3   : > { %v1216_v46 = vsub.f32 %v1212_v45, %v4171_v60 }
 0xad4   : > { %v1215_v63 = vsub.f32 %v1211_v41, %v4171_v60 }
 0xad5   : > { %v4454_v59 = vsel %vm322_vm2, -1e+09, %v1216_v46 }
 0xad6   : > { %v4448_v40 = vsel %vm322_vm2, -1e+09, %v1215_v63  ;;  %v1234_v48 = vsel %vm579_vm5, %v4454_v59, -inf }
 0xad7   : > { %v1231_v47 = vsel %vm579_vm5, %v4448_v40, -inf }
 0xad8   : > { %1232 = vmax.xlane.f32.xlu0 %v1231_v47 }
 0xadc   : > { %1235 = vmax.xlane.f32.xlu0 %v1234_v48 }
 0xae0   : > { %1492 = vrot.lane.b32.xlu1 %v4364_v28, %s3892_s15 }
 0xae4   : > { %1495 = vrot.lane.b32.xlu1 %v4364_v28, %s3891_s14 }
 0xae8   : > { %1502 = vrot.lane.b32.xlu1 %v4366_v29, %s3892_s15 }
 0xb5c   : > { %v1230_v49 = vpop.xlane.xlu1 %1229 }
 0xb5d   : > { %v1238_v50 = vsub.f32 %v4426_v37, %v1230_v49  ;;  %v1227_v51 = vpop.xlane.xlu0 %1226  ;;  %v1222_v49 = vmul.f32 0.0, %v4253_v7 }
 0xb5e   : > { %v1237_v9 = vsub.f32 %v4439_v58, %v1227_v51 }
 0xb5f   : > { %v1243_v52 = vmul.f32 1.442695, %v1238_v50  ;;  %v1221_v50 = vmul.f32 0.0, %v4255_v8 }
 0xb60   : > { %v1241_v11 = vmul.f32 1.442695, %v1237_v9 }
 0xb61   : > { %3699 = vpow2.f32 %v1243_v52  ;;  %v1493_v52 = vpop.permute.xlu1 %1492 }
 0xb62   : > { %3701 = vpow2.f32 %v1241_v11 }
 0xb65   : > { %v1233_v12 = vpop.xlane.xlu0 %1232 }
 0xb66   : > { %v1239_v13 = vsub.f32 %v4448_v40, %v1233_v12 }
 0xb68   : > { %v1245_v21 = vmul.f32 1.442695, %v1239_v13 }
 0xb69   : > { %v1236_v42 = vpop.xlane.xlu0 %1235 }
 0xb6a   : > { %v1240_v17 = vsub.f32 %v4454_v59, %v1236_v42 }
 0xb6b   : > { %v3700_v18 = vpop.eup %3699 }
 0xb6c   : > { %v1247_v54 = vmul.f32 1.442695, %v1240_v17  ;;  %v1252_v5 = vsel %vm579_vm5, %v3700_v18, 0.0  ;;  %v3702_v3 = vpop.eup %3701 }
 0xb6d   : > { %1253 = vadd.xlane.f32.xlu0 %v1252_v5  ;;  %v1249_v22 = vsel %vm579_vm5, %v3702_v3, 0.0 }
 0xb6e   : > { %3703 = vpow2.f32 %v1247_v54 }
 0xb6f   : > { %3705 = vpow2.f32 %v1245_v21 }
 0xb71   : > { %1250 = vadd.xlane.f32.xlu0 %v1249_v22  ;;  %v1223_v22 = vmul.f32 0.0, %v4260_v14 }
 0xb78   : > { %v3704_v24 = vpop.eup %3703 }
 0xb79   : > { %v1258_v62 = vsel %vm579_vm5, %v3704_v24, 0.0  ;;  %v3706_v0 = vpop.eup %3705 }
 0xb7a   : > { %1259 = vadd.xlane.f32.xlu0 %v1258_v62  ;;  %v1255_v44 = vsel %vm579_vm5, %v3706_v0, 0.0  ;;  %v1224_v62 = vmul.f32 0.0, %v4262_v16 }
 0xb7e   : > { %1256 = vadd.xlane.f32.xlu0 %v1255_v44 }
 0xb94   : > { %1489 = vrot.lane.b32.xlu0 %v4364_v28, %s3890_s13 }
 0xb98   : > { %1499 = vrot.lane.b32.xlu0 %v4366_v29, %s3890_s13 }
 0xbfa   : > { %v1254_v45 = vpop.xlane.xlu0 %1253 }
 0xbfb   : > { %3707 = vrcp.f32 %v1254_v45 }
 0xbfe   : > { %v1251_v41 = vpop.xlane.xlu0 %1250 }
 0xbff   : > { %3709 = vrcp.f32 %v1251_v41 }
 0xc05   : > { %v3708_v63 = vpop.eup %3707 }
 0xc06   : > { %v1266_v47 = vmul.f32 %v3708_v63, %v3700_v18  ;;  %v1496_v18 = vpop.permute.xlu1 %1495 }
 0xc07   : > { %v1260_v46 = vpop.xlane.xlu0 %1259  ;;  %v3449_v7 = vpack.c.bf16 %v1496_v18, %v1493_v52 }
 0xc08   : > { %3711 = vrcp.f32 %v1260_v46  ;;  %v4478_v11 = vadd.f32 %v1266_v47, %v1222_v49 }
 0xc09   : > { %v3710_v48 = vpop.eup %3709 }
 0xc0a   : > { %v1265_v51 = vmul.f32 %v3710_v48, %v3702_v3  ;;  %v1503_v46 = vpop.permute.xlu1 %1502  ;;  %v1410_v30 = vsel %vm4182_vm4, %v4478_v11, 0.0  ;;  %v1414_v35 = vsel %vm4178_vm3, %v4478_v11, 0.0 }
 0xc0b   : > { %v1257_v9 = vpop.xlane.xlu0 %1256 }
 0xc0c   : > { %v4480_v12 = vadd.f32 %v1265_v51, %v1221_v50  ;;  %3713 = vrcp.f32 %v1257_v9 }
 0xc0e   : > { %v3633_v13 = vpack.i.bf16 %v4478_v11, %v4480_v12  ;;  %v1409_v18 = vsel %vm4182_vm4, %v4480_v12, 0.0  ;;  %v1413_v31 = vsel %vm4178_vm3, %v4480_v12, 0.0 }
 0xc0f   : > { %v1490_v42 = vpop.permute.xlu0 %1489 }
 0xc10   : > { %v3446_v17 = vpack.c.bf16 %v1490_v42, %v4364_v28  ;;  %3634 = vxpose.xlu0.b32.start.end [1/1] (short) (narrow) %v3633_v13, 8 }
 0xc12   : > { %v3712_v21 = vpop.eup %3711  ;;  %3447 = vmatpush3.bf16.msra.mxu1 %v3446_v17 }
 0xc13   : > { %3448 = vmatprep.subr.bf16.mxu1 %v3893_v32  ;;  %v1268_v8 = vmul.f32 %v3712_v21, %v3704_v24  ;;  %v1500_v54 = vpop.permute.xlu0 %1499  ;;  %v4559_v21 = vld [vmem:[%s4058_s12] sm:$0xff]  ;;  %s3895_s12 = smov [#allocation7]  }
 0xc14   : > { %v3452_v28 = vpack.c.bf16 %v1500_v54, %v4366_v29 }
 0xc15   : > { %v4492_v45 = vadd.f32 %v1268_v8, %v1224_v62 }
 0xc16   : > { %v3714_v5 = vpop.eup %3713  ;;  %3450 = vmatpush3.bf16.msra.mxu1 %v3449_v7 }
 0xc17   : > { %v1267_v3 = vmul.f32 %v3714_v5, %v3706_v0  ;;  %3451 = vmatprep.subr.bf16.mxu1 %v3893_v32  ;;  %v1412_v27 = vsel %vm4182_vm4, %v4492_v45, 0.0  ;;  %v1416_v53 = vsel %vm4178_vm3, %v4492_v45, 0.0 }
 0xc19   : > { %v4490_v44 = vadd.f32 %v1267_v3, %v1223_v22 }
 0xc1a   : > { %3453 = vmatpush3.bf16.msra.mxu1 %v3452_v28 }
 0xc1b   : > { %v3640_v24 = vpack.i.bf16 %v4492_v45, %v4490_v44  ;;  %3454 = vmatprep.subr.bf16.mxu1 %v3893_v32 }
 0xc1d   : > { %3641 = vxpose.xlu1.b32.start.end [1/1] (short) (narrow) %v3640_v24, 8 }
 0xc39   : > { %1505 = vrot.lane.b32.xlu0 %v4366_v29, %s3891_s14 }
 0xc90   : > { %v3635_v0 = vpop.trf.xlu0 }
 0xc91   : > { %v3636_v14 = vunpack.i.l.bf16 %v3635_v0  ;;  %v3639_v41 = vunpack.i.h.bf16 %v3635_v0 }
 0xc93   : > { %v1401_v16 = vsel %vm4178_vm3, %v3636_v14, 0.0  ;;  %v1402_v63 = vsel %vm4178_vm3, %v3639_v41, 0.0  ;;  %v1405_v51 = vsel %vm4182_vm4, %v3636_v14, 0.0  ;;  %v1406_v13 = vsel %vm4182_vm4, %v3639_v41, 0.0 }
 0xc94   : > { %1508 = vxpose.xlu1.b32.start [1/16] (narrow) %v1401_v16, 8  ;;  %v1613_v14 = vmul.f32 0.0, %v4336_v23 }
 0xc98   : > { %1509 = vxpose.xlu1.b32.cont [2/16] (narrow) %v1402_v63, 8 }
 0xc9d   : > { %v3642_v47 = vpop.trf.xlu1 }
 0xc9e   : > { %v3643_v48 = vunpack.i.l.bf16 %v3642_v47  ;;  %v3646_v50 = vunpack.i.h.bf16 %v3642_v47 }
 0xca0   : > { %v1403_v49 = vsel %vm4178_vm3, %v3643_v48, 0.0  ;;  %v1404_v29 = vsel %vm4178_vm3, %v3646_v50, 0.0  ;;  %v1407_v42 = vsel %vm4182_vm4, %v3643_v48, 0.0  ;;  %v1408_v17 = vsel %vm4182_vm4, %v3646_v50, 0.0 }
 0xca1   : > { %1510 = vxpose.xlu1.b32.cont [3/16] (narrow) %v1403_v49, 8 }
 0xca5   : > { %1511 = vxpose.xlu1.b32.cont [4/16] (narrow) %v1404_v29, 8 }
 0xca9   : > { %1512 = vxpose.xlu1.b32.cont [5/16] (narrow) %v1405_v51, 8 }
 0xcab   : > { %v1506_v52 = vpop.permute.xlu0 %1505 }
 0xcac   : > { %v3455_v9 = vpack.c.bf16 %v1506_v52, %v1503_v46 }
 0xcad   : > { %1513 = vxpose.xlu1.b32.cont [6/16] (narrow) %v1406_v13, 8 }
 0xcae   : > { %3456 = vmatpush3.bf16.msra.mxu1 %v3455_v9 }
 0xcaf   : > { %3457 = vmatprep.subr.bf16.mxu1 %v3893_v32 }
 0xcb1   : > { %1514 = vxpose.xlu1.b32.cont [7/16] (narrow) %v1407_v42, 8 }
 0xcb2   : > { %3459 = vmatpush3.bf16.msra.mxu1 %v3458_v43  ;;  %v1411_v43 = vsel %vm4182_vm4, %v4490_v44, 0.0 }
 0xcb3   : > { %3460 = vmatprep.subr.bf16.mxu1 %v3893_v32 }
 0xcb5   : > { %1515 = vxpose.xlu1.b32.cont [8/16] (narrow) %v1408_v17, 8 }
 0xcb6   : > { %3462 = vmatpush3.bf16.msra.mxu1 %v3461_v38  ;;  %v1415_v38 = vsel %vm4178_vm3, %v4490_v44, 0.0 }
 0xcb7   : > { %3463 = vmatprep.subr.bf16.mxu1 %v3893_v32 }
 0xcb9   : > { %1516 = vxpose.xlu1.b32.cont [9/16] (narrow) %v1409_v18, 8 }
 0xcba   : > { %3465 = vmatpush3.bf16.msra.mxu1 %v3464_v55 }
 0xcbb   : > { %3466 = vmatprep.subr.bf16.mxu1 %v3893_v32 }
 0xcbd   : > { %1517 = vxpose.xlu1.b32.cont [10/16] (narrow) %v1410_v30, 8 }
 0xcbe   : > { %3468 = vmatpush3.bf16.msra.mxu1 %v3467_v33 }
 0xcbf   : > { %3485 = vmatprep.subr.bf16.mxu1 %v3893_v32 }
 0xcc1   : > { %1518 = vxpose.xlu1.b32.cont [11/16] (narrow) %v1411_v43, 8 }
 0xcc5   : > { %1519 = vxpose.xlu1.b32.cont [12/16] (narrow) %v1412_v27, 8 }
 0xcc9   : > { %1520 = vxpose.xlu1.b32.cont [13/16] (narrow) %v1413_v31, 8  ;;  %v1851_v31 = vmul.f32 0.0, %v4426_v37 }
 0xccd   : > { %1521 = vxpose.xlu1.b32.cont [14/16] (narrow) %v1414_v35, 8 }
 0xcd1   : > { %1522 = vxpose.xlu1.b32.cont [15/16] (narrow) %v1415_v38, 8 }
 0xcd5   : > { %1523 = vxpose.xlu1.b32.end [16/16] (narrow) %v1416_v53, 8 }
 0xd19   : > { %v1524_v55 = vpop.trf.xlu1 }
 0xd1a   : > { %3289 = vmatmul.mubr.f32.vlgmr.msra.gmra.mrb[18].mxu1 %v1524_v55 }
 0xd1b   : > { %3337 = vmatprep.mubr.msk.f32.mxu1 %vm3894_vm6, %v3889_v1 }
 0xded   : > { %v1606_v56 = vpop.f32.mrb[18].mxu1 }
 0xdee   : > { %v1611_v7 = vadd.f32 %v4559_v21, %v1606_v56  ;;  %v3290_v8 = vpop.f32.mrb[19].mxu1 }
 0xdf0   : > { %v4562_v54 = vadd.f32 %v1611_v7, %v1610_v57 }
 0xdf2   : > { %v1614_v5 = vsel %vm326_vm0, %v4562_v54, -inf }
 0xdf3   : > { %1615 = vmax.xlane.f32.xlu0 %v1614_v5 }
 0xe80   : > { %v1616_v3 = vpop.xlane.xlu0 %1615 }
 0xe81   : > { %v1617_v22 = vsub.f32 %v4562_v54, %v1616_v3 }
 0xe83   : > { %v1618_v62 = vmul.f32 1.442695, %v1617_v22 }
 0xe85   : > { %3715 = vpow2.f32 %v1618_v62 }
 0xe8f   : > { %v3716_v28 = vpop.eup %3715 }
 0xe90   : > { %v1620_v24 = vsel %vm326_vm0, %v3716_v28, 0.0 }
 0xe91   : > { %1621 = vadd.xlane.f32.xlu0 %v1620_v24 }
 0xf1e   : > { %v1622_v10 = vpop.xlane.xlu0 %1621 }
 0xf1f   : > { %3717 = vrcp.f32 %v1622_v10 }
 0xf29   : > { %v3718_v0 = vpop.eup %3717 }
 0xf2a   : > { %v1624_v41 = vmul.f32 %v3718_v0, %v3716_v28  ;;  %v1850_v28 = vmul.f32 0.0, %v4439_v58  ;;  %v1853_v0 = vmul.f32 0.0, %v4454_v59 }
 0xf2c   : > { %v4569_v16 = vadd.f32 %v1624_v41, %v1613_v14 }
 0xf2e   : > { %v1626_v63 = vmul.f32 %v4569_v16, %v4063_v4 }
 0xf30   : > { %3063 = vmatmul.mubr.msk.f32.vlgmr.msra.gmra.mrb[8].mxu0 %vm326_vm0, %v1626_v63  ;;  %3291 = vmatprep.subr.msk.mxu0 %vm326_vm0, %v1626_v63 }
 0xf31   : > { %3292 = vmatpush3.xpose.msk.msra.mxu0 %vm326_vm0, %v1626_v63 }
 0xf32   : > { %3478 = vmatprep.subr.bf16.mxu0 %v4084_v26 }
0x1003   : > { %v4577_v46 = vpop.f32.mrb[8].mxu0 }
0x1004   : > { %1702 = vrot.lane.b32.xlu0 %v4577_v46, %s3890_s13  ;;  %v4581_v23 = vpop.f32.mrb[9].mxu0  ;;  %3293 = vmatprep.mubr.msk.f32.mxu0 %vm326_vm0, %v4577_v46 }
0x1008   : > { %1705 = vrot.lane.b32.xlu0 %v4577_v46, %s3892_s15 }
0x100c   : > { %1708 = vrot.lane.b32.xlu0 %v4577_v46, %s3891_s14 }
0x1010   : > { %1712 = vrot.lane.b32.xlu0 %v4581_v23, %s3890_s13 }
0x1014   : > { %1715 = vrot.lane.b32.xlu0 %v4581_v23, %s3892_s15 }
0x1018   : > { %1718 = vrot.lane.b32.xlu0 %v4581_v23, %s3891_s14 }
0x1076   : > { %v4595_v47 = vpop.permute.xlu0 %1702 }
0x1077   : > { %v3498_v48 = vpack.c.bf16 %v4595_v47, %v4577_v46  ;;  %3294 = vmatmul.mubr.msk.f32.vlgmr.msra.gmra.mrb[10].mxu0 %vm326_vm0, %v4595_v47 }
0x1078   : > { %3480 = vmatpush1.bf16.msra.mxu0 %v4090_v34 }
0x1079   : > { %3482 = vmatprep.subr.bf16.mxu0 %v4094_v36 }
0x107a   : > { %v4603_v49 = vpop.permute.xlu0 %1705 }
0x107b   : > { %3296 = vmatprep.mubr.msk.f32.mxu0 %vm326_vm0, %v4603_v49 }
0x107c   : > { %3484 = vmatpush1.bf16.msra.mxu0 %v4100_v39 }
0x107d   : > { %3510 = vmatprep.subr.bf16.mxu0 %v4073_v15 }
0x107e   : > { %v4609_v50 = vpop.permute.xlu0 %1708 }
0x107f   : > { %v3501_v29 = vpack.c.bf16 %v4609_v50, %v4603_v49  ;;  %3297 = vmatmul.mubr.msk.f32.gmra.mrb[12].mxu0 %vm326_vm0, %v4609_v50 }
0x1080   : > { %3299 = vmatprep.mubr.msk.f32.mxu0 %vm326_vm0, %v4581_v23 }
0x1082   : > { %v4617_v51 = vpop.permute.xlu0 %1712 }
0x1083   : > { %v3504_v52 = vpack.c.bf16 %v4617_v51, %v4581_v23  ;;  %3300 = vmatmul.mubr.msk.f32.gmra.mrb[14].mxu0 %vm326_vm0, %v4617_v51 }
0x1086   : > { %v4623_v15 = vpop.permute.xlu0 %1715 }
0x1087   : > { %3302 = vmatprep.mubr.msk.f32.mxu0 %vm326_vm0, %v4623_v15 }
0x108a   : > { %v4627_v9 = vpop.permute.xlu0 %1718 }
0x108b   : > { %3303 = vmatmul.mubr.msk.f32.gmra.mrb[16].mxu0 %vm326_vm0, %v4627_v9  ;;  %v3507_v47 = vpack.c.bf16 %v4627_v9, %v4623_v15 }
0x108c   : > { %2130 = vmatprep.mubr.f32.mxu0 %v3889_v1 }
0x108f   : > { %3073 = vmatmul.mubr.msk.f32.vlgmr.msra.gmra.mrb[18].mxu0 %vm326_vm0, %v1626_v63 }
0x1090   : > { %3512 = vmatpush1.bf16.msra.mxu0 %v4075_v19  ;;  %2343 = vmatprep.mubr.f32.mxu0 %v3889_v1 }
0x1091   : > { %3514 = vmatprep.subr.bf16.mxu0 %v4077_v20 }
0x1094   : > { %3516 = vmatpush1.bf16.msra.mxu0 %v4081_v25 }
0x114a   : > { %v3295_v13 = vpop.f32.mrb[10].mxu0 }
0x114b   : > { %v1803_v42 = vpop.f32.mrb[11].mxu0 }
0x1152   : > { %v3298_v17 = vpop.f32.mrb[12].mxu0 }
0x1153   : > { %v1813_v18 = vpop.f32.mrb[13].mxu0 }
0x1156   : > { %v3301_v33 = vpop.f32.mrb[14].mxu0 }
0x1157   : > { %v1843_v30 = vsel %vm4178_vm3, %v3301_v33, 0.0  ;;  %v1823_v43 = vpop.f32.mrb[15].mxu0 }
0x1158   : > { %v1847_v27 = vsel %vm4182_vm4, %v3295_v13, %v1843_v30  ;;  %v1842_v19 = vsel %vm4178_vm3, %v1823_v43, 0.0  ;;  %v1852_v13 = vmul.f32 0.0, %v4448_v40 }
0x1159   : > { %v1855_v20 = vmul.f32 32.0, %v1847_v27  ;;  %v1846_v25 = vsel %vm4182_vm4, %v1803_v42, %v1842_v19 }
0x115a   : > { %v1854_v62 = vmul.f32 32.0, %v1846_v25 }
0x115b   : > { %v1859_v35 = vadd.f32 %v1855_v20, %v1851_v31 }
0x115c   : > { %v1858_v24 = vadd.f32 %v1854_v62, %v1850_v28 }
0x115d   : > { %v1863_v38 = vsub.f32 %v1859_v35, %v4171_v60 }
0x115e   : > { %v3304_v53 = vpop.f32.mrb[16].mxu0  ;;  %v1862_v63 = vsub.f32 %v1858_v24, %v4171_v60 }
0x115f   : > { %v1845_v55 = vsel %vm4178_vm3, %v3304_v53, 0.0  ;;  %v1833_v56 = vpop.f32.mrb[17].mxu0  ;;  %v4651_v57 = vsel %vm322_vm2, -1e+09, %v1863_v38 }
0x1160   : > { %v1849_v7 = vsel %vm4182_vm4, %v3298_v17, %v1845_v55  ;;  %v1844_v37 = vsel %vm4178_vm3, %v1833_v56, 0.0  ;;  %v1877_v8 = vsel %vm579_vm5, %v4651_v57, -inf  ;;  %v4673_v17 = vsel %vm322_vm2, -1e+09, %v1862_v63 }
0x1161   : > { %v1848_v5 = vsel %vm4182_vm4, %v1813_v18, %v1844_v37  ;;  %1878 = vmax.xlane.f32.xlu1 %v1877_v8  ;;  %v1857_v10 = vmul.f32 32.0, %v1849_v7  ;;  %v1874_v18 = vsel %vm579_vm5, %v4673_v17, -inf }
0x1162   : > { %v2132_v3 = vpop.f32.mrb[18].mxu0  ;;  %v1856_v41 = vmul.f32 32.0, %v1848_v5 }
0x1163   : > { %2138 = vrot.lane.b32.xlu0 %v2132_v3, %s3890_s13  ;;  %v4662_v22 = vpop.f32.mrb[19].mxu0  ;;  %v1861_v14 = vadd.f32 %v1857_v10, %v1853_v0 }
0x1164   : > { %v1860_v42 = vadd.f32 %v1856_v41, %v1852_v13 }
0x1165   : > { %v1865_v58 = vsub.f32 %v1861_v14, %v4171_v60 }
0x1166   : > { %v1864_v33 = vsub.f32 %v1860_v42, %v4171_v60 }
0x1167   : > { %v4680_v59 = vsel %vm322_vm2, -1e+09, %v1865_v58 }
0x1168   : > { %v1883_v40 = vsel %vm579_vm5, %v4680_v59, -inf  ;;  %v4687_v30 = vsel %vm322_vm2, -1e+09, %v1864_v33 }
0x1169   : > { %v1880_v43 = vsel %vm579_vm5, %v4687_v30, -inf }
0x1172   : > { %2141 = vrot.lane.b32.xlu1 %v2132_v3, %s3892_s15 }
0x1176   : > { %2148 = vrot.lane.b32.xlu1 %v4662_v22, %s3890_s13 }
0x1182   : > { %1875 = vmax.xlane.f32.xlu0 %v1874_v18 }
0x1186   : > { %1884 = vmax.xlane.f32.xlu0 %v1883_v40 }
0x118a   : > { %1881 = vmax.xlane.f32.xlu0 %v1880_v43 }
0x11a0   : > { %2144 = vrot.lane.b32.xlu0 %v2132_v3, %s3891_s14 }
0x11d5   : > { %v2139_v27 = vpop.permute.xlu0 %2138 }
0x11d6   : > { %v3486_v19 = vpack.c.bf16 %v2139_v27, %v2132_v3 }
0x11d8   : > { %3487 = vmatpush3.bf16.msra.mxu1 %v3486_v19 }
0x11d9   : > { %3488 = vmatprep.subr.bf16.mxu1 %v3893_v32 }
0x11ee   : > { %v1879_v31 = vpop.xlane.xlu1 %1878 }
0x11ef   : > { %v1887_v20 = vsub.f32 %v4651_v57, %v1879_v31 }
0x11f1   : > { %v1892_v25 = vmul.f32 1.442695, %v1887_v20 }
0x11f2   : > { %v2142_v5 = vpop.permute.xlu1 %2141 }
0x11f3   : > { %3719 = vpow2.f32 %v1892_v25  ;;  %v1871_v25 = vmul.f32 0.0, %v4478_v11 }
0x11f6   : > { %v2149_v0 = vpop.permute.xlu1 %2148 }
0x11f7   : > { %v3492_v63 = vpack.c.bf16 %v2149_v0, %v4662_v22 }
0x11fd   : > { %v3720_v35 = vpop.eup %3719 }
0x11fe   : > { %v1901_v38 = vsel %vm579_vm5, %v3720_v35, 0.0 }
0x11ff   : > { %1902 = vadd.xlane.f32.xlu0 %v1901_v38  ;;  %v1870_v38 = vmul.f32 0.0, %v4480_v12 }
0x120f   : > { %v1876_v53 = vpop.xlane.xlu0 %1875 }
0x1210   : > { %v1886_v55 = vsub.f32 %v4673_v17, %v1876_v53 }
0x1212   : > { %v1890_v56 = vmul.f32 1.442695, %v1886_v55 }
0x1213   : > { %v1885_v7 = vpop.xlane.xlu0 %1884 }
0x1214   : > { %3721 = vpow2.f32 %v1890_v56  ;;  %v1889_v37 = vsub.f32 %v4680_v59, %v1885_v7 }
0x1216   : > { %v1896_v8 = vmul.f32 1.442695, %v1889_v37 }
0x1217   : > { %v1882_v3 = vpop.xlane.xlu0 %1881 }
0x1218   : > { %3723 = vpow2.f32 %v1896_v8  ;;  %v1888_v62 = vsub.f32 %v4687_v30, %v1882_v3 }
0x121a   : > { %v1894_v28 = vmul.f32 1.442695, %v1888_v62  ;;  %v1873_v62 = vmul.f32 0.0, %v4492_v45 }
0x121b   : > { %v2145_v24 = vpop.permute.xlu0 %2144 }
0x121c   : > { %3725 = vpow2.f32 %v1894_v28  ;;  %v3489_v10 = vpack.c.bf16 %v2145_v24, %v2142_v5 }
0x121e   : > { %v3722_v14 = vpop.eup %3721  ;;  %3490 = vmatpush3.bf16.msra.mxu1 %v3489_v10 }
0x121f   : > { %v1898_v41 = vsel %vm579_vm5, %v3722_v14, 0.0  ;;  %3491 = vmatprep.subr.bf16.mxu1 %v3893_v32 }
0x1220   : > { %1899 = vadd.xlane.f32.xlu0 %v1898_v41 }
0x1222   : > { %v3724_v13 = vpop.eup %3723  ;;  %3493 = vmatpush3.bf16.msra.mxu1 %v3492_v63 }
0x1223   : > { %v1907_v42 = vsel %vm579_vm5, %v3724_v13, 0.0  ;;  %3494 = vmatprep.subr.bf16.mxu1 %v3893_v32 }
0x1224   : > { %1908 = vadd.xlane.f32.xlu0 %v1907_v42 }
0x1226   : > { %v3726_v58 = vpop.eup %3725 }
0x1227   : > { %v1904_v18 = vsel %vm579_vm5, %v3726_v58, 0.0 }
0x1228   : > { %1905 = vadd.xlane.f32.xlu0 %v1904_v18 }
0x128c   : > { %v1903_v33 = vpop.xlane.xlu0 %1902 }
0x128d   : > { %3727 = vrcp.f32 %v1903_v33 }
0x1297   : > { %v3728_v27 = vpop.eup %3727 }
0x1298   : > { %v1915_v31 = vmul.f32 %v3728_v27, %v3720_v35  ;;  %v1872_v35 = vmul.f32 0.0, %v4490_v44 }
0x129a   : > { %v4706_v55 = vadd.f32 %v1915_v31, %v1871_v25 }
0x129c   : > { %v2059_v31 = vsel %vm4182_vm4, %v4706_v55, 0.0  ;;  %v2063_v49 = vsel %vm4178_vm3, %v4706_v55, 0.0 }
0x12ad   : > { %v1900_v40 = vpop.xlane.xlu0 %1899 }
0x12ae   : > { %3729 = vrcp.f32 %v1900_v40 }
0x12b1   : > { %v1909_v43 = vpop.xlane.xlu0 %1908 }
0x12b2   : > { %3731 = vrcp.f32 %v1909_v43 }
0x12b5   : > { %v1906_v19 = vpop.xlane.xlu0 %1905 }
0x12b6   : > { %3733 = vrcp.f32 %v1906_v19 }
0x12b8   : > { %v3730_v20 = vpop.eup %3729 }
0x12b9   : > { %v1914_v53 = vmul.f32 %v3730_v20, %v3722_v14 }
0x12bb   : > { %v4708_v56 = vadd.f32 %v1914_v53, %v1870_v38 }
0x12bc   : > { %v3732_v7 = vpop.eup %3731 }
0x12bd   : > { %v3647_v37 = vpack.i.bf16 %v4706_v55, %v4708_v56  ;;  %v1917_v8 = vmul.f32 %v3732_v7, %v3724_v13  ;;  %v2058_v19 = vsel %vm4182_vm4, %v4708_v56, 0.0  ;;  %v2062_v23 = vsel %vm4178_vm3, %v4708_v56, 0.0 }
0x12bf   : > { %3648 = vxpose.xlu0.b32.start.end [1/1] (short) (narrow) %v3647_v37, 8  ;;  %v4716_v12 = vadd.f32 %v1917_v8, %v1873_v62  ;;  %v2262_v37 = vmul.f32 0.0, %v4569_v16 }
0x12c0   : > { %v3734_v5 = vpop.eup %3733 }
0x12c1   : > { %v1916_v3 = vmul.f32 %v3734_v5, %v3726_v58 }
0x12c3   : > { %v4714_v11 = vadd.f32 %v1916_v3, %v1872_v35 }
0x12c5   : > { %v3654_v28 = vpack.i.bf16 %v4716_v12, %v4714_v11  ;;  %v2060_v46 = vsel %vm4182_vm4, %v4714_v11, 0.0  ;;  %v2064_v50 = vsel %vm4178_vm3, %v4714_v11, 0.0 }
0x12c7   : > { %3655 = vxpose.xlu1.b32.start.end [1/1] (short) (narrow) %v3654_v28, 8 }
0x12e5   : > { %2154 = vrot.lane.b32.xlu1 %v4662_v22, %s3891_s14 }
0x12e8   : > { %2151 = vrot.lane.b32.xlu0 %v4662_v22, %s3892_s15 }
0x133f   : > { %v3649_v24 = vpop.trf.xlu0 }
0x1340   : > { %v3650_v10 = vunpack.i.l.bf16 %v3649_v24  ;;  %v3653_v0 = vunpack.i.h.bf16 %v3649_v24 }
0x1342   : > { %v2050_v44 = vsel %vm4178_vm3, %v3650_v10, 0.0  ;;  %v2051_v45 = vsel %vm4178_vm3, %v3653_v0, 0.0  ;;  %v2054_v42 = vsel %vm4182_vm4, %v3650_v10, 0.0  ;;  %v2055_v58 = vsel %vm4182_vm4, %v3653_v0, 0.0 }
0x1343   : > { %2157 = vxpose.xlu0.b32.start [1/16] (narrow) %v2050_v44, 8 }
0x1347   : > { %v3656_v14 = vpop.trf.xlu1  ;;  %2158 = vxpose.xlu0.b32.cont [2/16] (narrow) %v2051_v45, 8 }
0x1348   : > { %v3657_v41 = vunpack.i.l.bf16 %v3656_v14  ;;  %v3660_v63 = vunpack.i.h.bf16 %v3656_v14 }
0x134a   : > { %v2052_v13 = vsel %vm4178_vm3, %v3657_v41, 0.0  ;;  %v2053_v22 = vsel %vm4178_vm3, %v3660_v63, 0.0  ;;  %v2056_v40 = vsel %vm4182_vm4, %v3657_v41, 0.0  ;;  %v2057_v27 = vsel %vm4182_vm4, %v3660_v63, 0.0 }
0x134b   : > { %2159 = vxpose.xlu0.b32.cont [3/16] (narrow) %v2052_v13, 8 }
0x134f   : > { %2160 = vxpose.xlu0.b32.cont [4/16] (narrow) %v2053_v22, 8 }
0x1353   : > { %2161 = vxpose.xlu0.b32.cont [5/16] (narrow) %v2054_v42, 8 }
0x1357   : > { %2162 = vxpose.xlu0.b32.cont [6/16] (narrow) %v2055_v58, 8  ;;  %v2155_v18 = vpop.permute.xlu1 %2154 }
0x135a   : > { %v2152_v33 = vpop.permute.xlu0 %2151 }
0x135b   : > { %v3495_v43 = vpack.c.bf16 %v2155_v18, %v2152_v33  ;;  %2163 = vxpose.xlu0.b32.cont [7/16] (narrow) %v2056_v40, 8 }
0x135d   : > { %3496 = vmatpush3.bf16.msra.mxu1 %v3495_v43 }
0x135e   : > { %3497 = vmatprep.subr.bf16.mxu1 %v3893_v32 }
0x135f   : > { %2164 = vxpose.xlu0.b32.cont [8/16] (narrow) %v2057_v27, 8 }
0x1361   : > { %3499 = vmatpush3.bf16.msra.mxu1 %v3498_v48  ;;  %v2061_v48 = vsel %vm4182_vm4, %v4716_v12, 0.0 }
0x1362   : > { %3500 = vmatprep.subr.bf16.mxu1 %v3893_v32 }
0x1363   : > { %2165 = vxpose.xlu0.b32.cont [9/16] (narrow) %v2058_v19, 8  ;;  %v2500_v19 = vmul.f32 0.0, %v4651_v57 }
0x1365   : > { %3502 = vmatpush3.bf16.msra.mxu1 %v3501_v29 }
0x1366   : > { %3503 = vmatprep.subr.bf16.mxu1 %v3893_v32 }
0x1367   : > { %2166 = vxpose.xlu0.b32.cont [10/16] (narrow) %v2059_v31, 8 }
0x1369   : > { %3505 = vmatpush3.bf16.msra.mxu1 %v3504_v52  ;;  %v2259_v52 = vmul.f32 0.0, %v4562_v54 }
0x136a   : > { %3506 = vmatprep.subr.bf16.mxu1 %v3893_v32 }
0x136b   : > { %2167 = vxpose.xlu0.b32.cont [11/16] (narrow) %v2060_v46, 8  ;;  %v2499_v46 = vmul.f32 0.0, %v4673_v17 }
0x136d   : > { %3508 = vmatpush3.bf16.msra.mxu1 %v3507_v47 }
0x136e   : > { %3518 = vmatprep.subr.bf16.mxu1 %v4084_v26  ;;  %v2065_v26 = vsel %vm4178_vm3, %v4716_v12, 0.0 }
0x136f   : > { %2168 = vxpose.xlu0.b32.cont [12/16] (narrow) %v2061_v48, 8 }
0x1373   : > { %2169 = vxpose.xlu0.b32.cont [13/16] (narrow) %v2062_v23, 8 }
0x1377   : > { %2170 = vxpose.xlu0.b32.cont [14/16] (narrow) %v2063_v49, 8 }
0x137b   : > { %2171 = vxpose.xlu0.b32.cont [15/16] (narrow) %v2064_v50, 8 }
0x137f   : > { %2172 = vxpose.xlu0.b32.end [16/16] (narrow) %v2065_v26, 8 }
0x13c3   : > { %v2173_v29 = vpop.trf.xlu0 }
0x13c4   : > { %3338 = vmatmul.mubr.f32.vlgmr.msra.gmra.mrb[20].mxu1 %v2173_v29 }
0x13c5   : > { %3520 = vmatpush1.bf16.msra.mxu1 %v4090_v34  ;;  %2779 = vmatprep.mubr.f32.mxu1 %v3889_v1 }
0x13c6   : > { %3522 = vmatprep.subr.bf16.mxu1 %v4094_v36 }
0x13c9   : > { %3524 = vmatpush1.bf16.msra.mxu1 %v4100_v39 }
0x1497   : > { %v2255_v51 = vpop.f32.mrb[20].mxu1 }
0x1498   : > { %v2260_v15 = vadd.f32 %v4559_v21, %v2255_v51  ;;  %v3339_v9 = vpop.f32.mrb[21].mxu1 }
0x149a   : > { %v4786_v20 = vadd.f32 %v2260_v15, %v2259_v52 }
0x149c   : > { %v2263_v25 = vsel %vm326_vm0, %v4786_v20, -inf }
0x149d   : > { %2264 = vmax.xlane.f32.xlu1 %v2263_v25  ;;  %v2502_v25 = vmul.f32 0.0, %v4680_v59 }
0x152a   : > { %v2265_v38 = vpop.xlane.xlu1 %2264 }
0x152b   : > { %v2266_v34 = vsub.f32 %v4786_v20, %v2265_v38 }
0x152d   : > { %v2267_v53 = vmul.f32 1.442695, %v2266_v34 }
0x152f   : > { %3735 = vpow2.f32 %v2267_v53 }
0x1539   : > { %v3736_v36 = vpop.eup %3735 }
0x153a   : > { %v2269_v39 = vsel %vm326_vm0, %v3736_v36, 0.0 }
0x153b   : > { %2270 = vadd.xlane.f32.xlu1 %v2269_v39 }
0x15c8   : > { %v2271_v7 = vpop.xlane.xlu1 %2270 }
0x15c9   : > { %3737 = vrcp.f32 %v2271_v7 }
0x15d3   : > { %v3738_v54 = vpop.eup %3737 }
0x15d4   : > { %v2273_v8 = vmul.f32 %v3738_v54, %v3736_v36  ;;  %v2501_v36 = vmul.f32 0.0, %v4687_v30 }
0x15d6   : > { %v2274_v5 = vadd.f32 %v2273_v8, %v2262_v37 }
0x15d8   : > { %v2275_v3 = vmul.f32 %v2274_v5, %v4063_v4 }
0x15da   : > { %3074 = vmatmul.mubr.msk.f32.vlgmr.msra.gmra.mrb[20].mxu0 %vm326_vm0, %v2275_v3  ;;  %3340 = vmatprep.subr.msk.mxu0 %vm326_vm0, %v2275_v3 }
0x15db   : > { %3084 = vmatmul.mubr.msk.f32.vlgmr.msra.gmra.mrb[22].mxu1 %vm326_vm0, %v2275_v3  ;;  %3341 = vmatpush3.xpose.msk.msra.mxu0 %vm326_vm0, %v2275_v3 }
0x15dc   : > { %3525 = vmatprep.subr.bf16.mxu0 %v3893_v32 }
0x16ad   : > { %v4799_v35 = vpop.f32.mrb[20].mxu0 }
0x16ae   : > { %v4801_v62 = vpop.f32.mrb[22].mxu1  ;;  %2351 = vrot.lane.b32.xlu1 %v4799_v35, %s3890_s13  ;;  %v4805_v16 = vpop.f32.mrb[21].mxu0  ;;  %3342 = vmatprep.mubr.msk.f32.mxu0 %vm326_vm0, %v4799_v35 }
0x16af   : > { %v4809_v4 = vpop.f32.mrb[23].mxu1 }
0x16b2   : > { %2354 = vrot.lane.b32.xlu1 %v4799_v35, %s3892_s15 }
0x16b6   : > { %2357 = vrot.lane.b32.xlu1 %v4799_v35, %s3891_s14 }
0x16ba   : > { %2361 = vrot.lane.b32.xlu1 %v4805_v16, %s3890_s13 }
0x16be   : > { %2364 = vrot.lane.b32.xlu1 %v4805_v16, %s3892_s15 }
0x16c2   : > { %2367 = vrot.lane.b32.xlu1 %v4805_v16, %s3891_s14 }
0x1720   : > { %v4821_v28 = vpop.permute.xlu1 %2351 }
0x1721   : > { %v3538_v24 = vpack.c.bf16 %v4821_v28, %v4799_v35  ;;  %3343 = vmatmul.mubr.msk.f32.vlgmr.msra.gmra.mrb[22].mxu0 %vm326_vm0, %v4821_v28 }
0x1724   : > { %v4827_v10 = vpop.permute.xlu1 %2354 }
0x1725   : > { %3345 = vmatprep.mubr.msk.f32.mxu0 %vm326_vm0, %v4827_v10 }
0x1728   : > { %v4831_v0 = vpop.permute.xlu1 %2357 }
0x1729   : > { %v3541_v44 = vpack.c.bf16 %v4831_v0, %v4827_v10  ;;  %3346 = vmatmul.mubr.msk.f32.gmra.mrb[24].mxu0 %vm326_vm0, %v4831_v0  ;;  %v2908_v0 = vmul.f32 0.0, %v4786_v20 }
0x172a   : > { %3348 = vmatprep.mubr.msk.f32.mxu0 %vm326_vm0, %v4805_v16 }
0x172c   : > { %v4839_v45 = vpop.permute.xlu1 %2361 }
0x172d   : > { %v3544_v14 = vpack.c.bf16 %v4839_v45, %v4805_v16  ;;  %3349 = vmatmul.mubr.msk.f32.gmra.mrb[26].mxu0 %vm326_vm0, %v4839_v45 }
0x1730   : > { %v4845_v41 = vpop.permute.xlu1 %2364 }
0x1731   : > { %3351 = vmatprep.mubr.msk.f32.mxu0 %vm326_vm0, %v4845_v41 }
0x1734   : > { %v4849_v63 = vpop.permute.xlu1 %2367 }
0x1735   : > { %3352 = vmatmul.mubr.msk.f32.gmra.mrb[28].mxu0 %vm326_vm0, %v4849_v63  ;;  %v3547_v28 = vpack.c.bf16 %v4849_v63, %v4845_v41 }
0x1736   : > { %3386 = vmatprep.mubr.msk.f32.mxu0 %vm3894_vm6, %v3889_v1 }
0x17f4   : > { %v3344_v13 = vpop.f32.mrb[22].mxu0 }
0x17f5   : > { %v2452_v22 = vpop.f32.mrb[23].mxu0 }
0x17fc   : > { %v3347_v42 = vpop.f32.mrb[24].mxu0 }
0x17fd   : > { %v2462_v58 = vpop.f32.mrb[25].mxu0 }
0x1800   : > { %v3350_v18 = vpop.f32.mrb[26].mxu0 }
0x1801   : > { %v2492_v33 = vsel %vm4178_vm3, %v3350_v18, 0.0  ;;  %v2472_v40 = vpop.f32.mrb[27].mxu0 }
0x1802   : > { %v2496_v43 = vsel %vm4182_vm4, %v3344_v13, %v2492_v33  ;;  %v2491_v27 = vsel %vm4178_vm3, %v2472_v40, 0.0 }
0x1803   : > { %v2504_v31 = vmul.f32 32.0, %v2496_v43  ;;  %v2495_v1 = vsel %vm4182_vm4, %v2452_v22, %v2491_v27 }
0x1804   : > { %v2503_v47 = vmul.f32 32.0, %v2495_v1 }
0x1805   : > { %v2508_v48 = vadd.f32 %v2504_v31, %v2500_v19 }
0x1806   : > { %v2507_v23 = vadd.f32 %v2503_v47, %v2499_v46 }
0x1807   : > { %v2512_v49 = vsub.f32 %v2508_v48, %v4171_v60 }
0x1808   : > { %v3353_v50 = vpop.f32.mrb[28].mxu0  ;;  %v2511_v26 = vsub.f32 %v2507_v23, %v4171_v60 }
0x1809   : > { %v2494_v29 = vsel %vm4178_vm3, %v3353_v50, 0.0  ;;  %v2482_v51 = vpop.f32.mrb[29].mxu0  ;;  %v2516_v57 = vsel %vm322_vm2, -1e+09, %v2512_v49 }
0x180a   : > { %v2498_v52 = vsel %vm4182_vm4, %v3347_v42, %v2494_v29  ;;  %v2493_v17 = vsel %vm4178_vm3, %v2482_v51, 0.0  ;;  %v2526_v15 = vsel %vm579_vm5, %v2516_v57, -inf  ;;  %v2515_v9 = vsel %vm322_vm2, -1e+09, %v2511_v26 }
0x180b   : > { %v2506_v38 = vmul.f32 32.0, %v2498_v52  ;;  %v2497_v34 = vsel %vm4182_vm4, %v2462_v58, %v2493_v17  ;;  %2527 = vmax.xlane.f32.xlu0 %v2526_v15  ;;  %v2523_v53 = vsel %vm579_vm5, %v2515_v9, -inf }
0x180c   : > { %v2505_v39 = vmul.f32 32.0, %v2497_v34  ;;  %2524 = vmax.xlane.f32.xlu1 %v2523_v53  ;;  %v2519_v34 = vmul.f32 0.0, %v4708_v56  ;;  %v2520_v53 = vmul.f32 0.0, %v4706_v55 }
0x180d   : > { %v2510_v7 = vadd.f32 %v2506_v38, %v2502_v25 }
0x180e   : > { %v2509_v54 = vadd.f32 %v2505_v39, %v2501_v36 }
0x180f   : > { %v2514_v37 = vsub.f32 %v2510_v7, %v4171_v60 }
0x1810   : > { %v2513_v8 = vsub.f32 %v2509_v54, %v4171_v60 }
0x1811   : > { %v2518_v59 = vsel %vm322_vm2, -1e+09, %v2514_v37 }
0x1812   : > { %v2532_v5 = vsel %vm579_vm5, %v2518_v59, -inf  ;;  %v2517_v3 = vsel %vm322_vm2, -1e+09, %v2513_v8 }
0x1813   : > { %2533 = vmax.xlane.f32.xlu1 %v2532_v5  ;;  %v2529_v13 = vsel %vm579_vm5, %v2517_v3, -inf }
0x1817   : > { %2530 = vmax.xlane.f32.xlu1 %v2529_v13  ;;  %v2521_v13 = vmul.f32 0.0, %v4714_v11 }
0x1898   : > { %v2528_v30 = vpop.xlane.xlu0 %2527 }
0x1899   : > { %v2536_v22 = vsub.f32 %v2516_v57, %v2528_v30  ;;  %v2525_v42 = vpop.xlane.xlu1 %2524 }
0x189a   : > { %v2535_v58 = vsub.f32 %v2515_v9, %v2525_v42 }
0x189b   : > { %v2541_v18 = vmul.f32 1.442695, %v2536_v22 }
0x189c   : > { %v2539_v33 = vmul.f32 1.442695, %v2535_v58 }
0x189d   : > { %3739 = vpow2.f32 %v2541_v18 }
0x189e   : > { %3741 = vpow2.f32 %v2539_v33 }
0x18a0   : > { %v2534_v60 = vpop.xlane.xlu1 %2533 }
0x18a1   : > { %v2538_v40 = vsub.f32 %v2518_v59, %v2534_v60 }
0x18a3   : > { %v2545_v43 = vmul.f32 1.442695, %v2538_v40 }
0x18a4   : > { %v2531_v47 = vpop.xlane.xlu1 %2530 }
0x18a5   : > { %3743 = vpow2.f32 %v2545_v43  ;;  %v2537_v48 = vsub.f32 %v2517_v3, %v2531_v47  ;;  %v2522_v3 = vmul.f32 0.0, %v4716_v12 }
0x18a7   : > { %v3740_v27 = vpop.eup %3739  ;;  %v2543_v23 = vmul.f32 1.442695, %v2537_v48 }
0x18a8   : > { %v2550_v19 = vsel %vm579_vm5, %v3740_v27, 0.0  ;;  %v3742_v61 = vpop.eup %3741 }
0x18a9   : > { %2551 = vadd.xlane.f32.xlu1 %v2550_v19  ;;  %v2547_v31 = vsel %vm579_vm5, %v3742_v61, 0.0  ;;  %3745 = vpow2.f32 %v2543_v23 }
0x18ad   : > { %2548 = vadd.xlane.f32.xlu1 %v2547_v31 }
0x18af   : > { %v3744_v1 = vpop.eup %3743 }
0x18b0   : > { %v2556_v46 = vsel %vm579_vm5, %v3744_v1, 0.0 }
0x18b1   : > { %2557 = vadd.xlane.f32.xlu0 %v2556_v46 }
0x18b3   : > { %v3746_v49 = vpop.eup %3745 }
0x18b4   : > { %v2553_v50 = vsel %vm579_vm5, %v3746_v49, 0.0 }
0x18be   : > { %2790 = vrot.lane.b32.xlu1 %v4801_v62, %s3892_s15 }
0x18c2   : > { %2793 = vrot.lane.b32.xlu1 %v4801_v62, %s3891_s14 }
0x18c6   : > { %2797 = vrot.lane.b32.xlu1 %v4809_v4, %s3890_s13 }
0x18c7   : > { %2787 = vrot.lane.b32.xlu0 %v4801_v62, %s3890_s13  ;;  %s3816_s13 = sshll.u32 %s3895_s12, 4  ;;  %s3817_s13 = int_to_ptr.vmem [resolvable:$false] %s3816_s13 }
0x18c8   : > { %p3819_p4 = scmp.lt.s32.totalorder %s4982_s10, %s3817_s13 }
0x18ea   : > { %2554 = vadd.xlane.f32.xlu1 %v2553_v50 }
0x1936   : > { %v2552_v26 = vpop.xlane.xlu1 %2551 }
0x1937   : > { %3747 = vrcp.f32 %v2552_v26 }
0x193a   : > { %v2549_v29 = vpop.xlane.xlu1 %2548 }
0x193b   : > { %3749 = vrcp.f32 %v2549_v29 }
0x193e   : > { %v2558_v51 = vpop.xlane.xlu0 %2557  ;;  %v2791_v57 = vpop.permute.xlu1 %2790 }
0x193f   : > { %3751 = vrcp.f32 %v2558_v51 }
0x1941   : > { %v3748_v52 = vpop.eup %3747 }
0x1942   : > { %v2794_v17 = vpop.permute.xlu1 %2793  ;;  %v2788_v15 = vpop.permute.xlu0 %2787  ;;  %v2564_v25 = vmul.f32 %v3748_v52, %v3740_v27 }
0x1943   : > { %v3526_v9 = vpack.c.bf16 %v2788_v15, %v4801_v62  ;;  %v3529_v39 = vpack.c.bf16 %v2794_v17, %v2791_v57 }
0x1944   : > { %v4909_v37 = vadd.f32 %v2564_v25, %v2520_v53 }
0x1945   : > { %v3750_v38 = vpop.eup %3749  ;;  %3527 = vmatpush3.bf16.msra.mxu0 %v3526_v9 }
0x1946   : > { %3528 = vmatprep.subr.bf16.mxu0 %v3893_v32  ;;  %v2563_v36 = vmul.f32 %v3750_v38, %v3742_v61  ;;  %v2798_v7 = vpop.permute.xlu1 %2797  ;;  %v2708_v50 = vsel %vm4182_vm4, %v4909_v37, 0.0  ;;  %v2712_v6 = vsel %vm4178_vm3, %v4909_v37, 0.0 }
0x1947   : > { %v3532_v8 = vpack.c.bf16 %v2798_v7, %v4809_v4 }
0x1948   : > { %v4907_v54 = vadd.f32 %v2563_v36, %v2519_v34 }
0x1949   : > { %3530 = vmatpush3.bf16.msra.mxu0 %v3529_v39  ;;  %v3752_v56 = vpop.eup %3751 }
0x194a   : > { %3531 = vmatprep.subr.bf16.mxu0 %v3893_v32  ;;  %v3661_v62 = vpack.i.bf16 %v4909_v37, %v4907_v54  ;;  %v2566_v59 = vmul.f32 %v3752_v56, %v3744_v1  ;;  %v2707_v23 = vsel %vm4182_vm4, %v4907_v54, 0.0  ;;  %v2711_v35 = vsel %vm4178_vm3, %v4907_v54, 0.0 }
0x194c   : > { %3662 = vxpose.xlu1.b32.start.end [1/1] (short) (narrow) %v3661_v62, 8  ;;  %v2570_v22 = vadd.f32 %v2566_v59, %v2522_v3 }
0x194d   : > { %3533 = vmatpush3.bf16.msra.mxu0 %v3532_v8 }
0x194e   : > { %3534 = vmatprep.subr.bf16.mxu0 %v3893_v32  ;;  %v2710_v29 = vsel %vm4182_vm4, %v2570_v22, 0.0 }
0x196a   : > { %2800 = vrot.lane.b32.xlu1 %v4809_v4, %s3892_s15 }
0x1977   : > { %v2555_v55 = vpop.xlane.xlu1 %2554 }
0x1978   : > { %3753 = vrcp.f32 %v2555_v55 }
0x1982   : > { %v3754_v5 = vpop.eup %3753 }
0x1983   : > { %v2565_v30 = vmul.f32 %v3754_v5, %v3746_v49 }
0x1985   : > { %v2569_v42 = vadd.f32 %v2565_v30, %v2521_v13 }
0x1987   : > { %v3668_v58 = vpack.i.bf16 %v2570_v22, %v2569_v42  ;;  %v2709_v26 = vsel %vm4182_vm4, %v2569_v42, 0.0  ;;  %v2713_v16 = vsel %vm4178_vm3, %v2569_v42, 0.0 }
0x1989   : > { %3669 = vxpose.xlu0.b32.start.end [1/1] (short) (narrow) %v3668_v58, 8 }
0x19b2   : > { %2803 = vrot.lane.b32.xlu0 %v4809_v4, %s3891_s14  ;;  %s3818_s14 = scalar_lea.vmem %s3817_s13, 256 }
0x19b3   : > { %p3820_p7 = scmp.lt.s32.totalorder %s3818_s14, %s3812_s11 }
0x19b5   : > { %p3821_p8 = por %p3820_p7, %p3819_p4 }
0x19b7   : > { %p3822_p11 = pnand %p3821_p8, %p3815_p3 }
0x19cc   : > { %v3663_v18 = vpop.trf.xlu1 }
0x19cd   : > { %v3664_v33 = vunpack.i.l.bf16 %v3663_v18  ;;  %v3667_v60 = vunpack.i.h.bf16 %v3663_v18 }
0x19cf   : > { %v2699_v40 = vsel %vm4178_vm3, %v3664_v33, 0.0  ;;  %v2700_v12 = vsel %vm4178_vm3, %v3667_v60, 0.0  ;;  %v2703_v61 = vsel %vm4182_vm4, %v3664_v33, 0.0  ;;  %v2704_v31 = vsel %vm4182_vm4, %v3667_v60, 0.0 }
0x19d0   : > { %2806 = vxpose.xlu1.b32.start [1/16] (narrow) %v2699_v40, 8 }
0x19d4   : > { %2807 = vxpose.xlu1.b32.cont [2/16] (narrow) %v2700_v12, 8 }
0x19dc   : > { %v2801_v47 = vpop.permute.xlu1 %2800 }
0x1a09   : > { %v3670_v11 = vpop.trf.xlu0 }
0x1a0a   : > { %v3671_v43 = vunpack.i.l.bf16 %v3670_v11  ;;  %v3674_v19 = vunpack.i.h.bf16 %v3670_v11 }
0x1a0c   : > { %v2701_v27 = vsel %vm4178_vm3, %v3671_v43, 0.0  ;;  %v2702_v4 = vsel %vm4178_vm3, %v3674_v19, 0.0  ;;  %v2705_v1 = vsel %vm4182_vm4, %v3671_v43, 0.0  ;;  %v2706_v46 = vsel %vm4182_vm4, %v3674_v19, 0.0 }
0x1a0d   : > { %2808 = vxpose.xlu1.b32.cont [3/16] (narrow) %v2701_v27, 8 }
0x1a11   : > { %2809 = vxpose.xlu1.b32.cont [4/16] (narrow) %v2702_v4, 8 }
0x1a15   : > { %2810 = vxpose.xlu1.b32.cont [5/16] (narrow) %v2703_v61, 8 }
0x1a19   : > { %2811 = vxpose.xlu1.b32.cont [6/16] (narrow) %v2704_v31, 8 }
0x1a1d   : > { %2812 = vxpose.xlu1.b32.cont [7/16] (narrow) %v2705_v1, 8 }
0x1a21   : > { %2813 = vxpose.xlu1.b32.cont [8/16] (narrow) %v2706_v46, 8 }
0x1a24   : > { %v2804_v48 = vpop.permute.xlu0 %2803 }
0x1a25   : > { %v3535_v49 = vpack.c.bf16 %v2804_v48, %v2801_v47  ;;  %2814 = vxpose.xlu1.b32.cont [9/16] (narrow) %v2707_v23, 8 }
0x1a27   : > { %3536 = vmatpush3.bf16.msra.mxu0 %v3535_v49 }
0x1a28   : > { %3537 = vmatprep.subr.bf16.mxu0 %v3893_v32 }
0x1a29   : > { %2815 = vxpose.xlu1.b32.cont [10/16] (narrow) %v2708_v50, 8 }
0x1a2b   : > { %3539 = vmatpush3.bf16.msra.mxu0 %v3538_v24  ;;  %v2714_v24 = vsel %vm4178_vm3, %v2570_v22, 0.0 }
0x1a2c   : > { %3540 = vmatprep.subr.bf16.mxu0 %v3893_v32 }
0x1a2d   : > { %2816 = vxpose.xlu1.b32.cont [11/16] (narrow) %v2709_v26, 8 }
0x1a2f   : > { %3542 = vmatpush3.bf16.msra.mxu0 %v3541_v44 }
0x1a30   : > { %3543 = vmatprep.subr.bf16.mxu0 %v3893_v32 }
0x1a31   : > { %2817 = vxpose.xlu1.b32.cont [12/16] (narrow) %v2710_v29, 8 }
0x1a33   : > { %3545 = vmatpush3.bf16.msra.mxu0 %v3544_v14 }
0x1a34   : > { %3546 = vmatprep.subr.bf16.mxu0 %v3893_v32 }
0x1a35   : > { %2818 = vxpose.xlu1.b32.cont [13/16] (narrow) %v2711_v35, 8 }
0x1a37   : > { %3548 = vmatpush3.bf16.msra.mxu0 %v3547_v28 }
0x1a39   : > { %2819 = vxpose.xlu1.b32.cont [14/16] (narrow) %v2712_v6, 8 }
0x1a3d   : > { %2820 = vxpose.xlu1.b32.cont [15/16] (narrow) %v2713_v16, 8 }
0x1a41   : > { %2821 = vxpose.xlu1.b32.end [16/16] (narrow) %v2714_v24, 8 }
0x1a85   : > { %v2822_v10 = vpop.trf.xlu1 }
0x1a86   : > { %3387 = vmatmul.mubr.f32.vlgmr.msra.gmra.mrb[30].mxu0 %v2822_v10 }
0x1b59   : > { %v2904_v32 = vpop.f32.mrb[30].mxu0 }
0x1b5a   : > { %v2909_v44 = vadd.f32 %v4559_v21, %v2904_v32  ;;  %v3388_v45 = vpop.f32.mrb[31].mxu0 }
0x1b5c   : > { %v2910_v14 = vadd.f32 %v2909_v44, %v2908_v0 }
0x1b5e   : > { %2911 = vst.msk [vmem:[%s269_s30] sm:$0xff] %vm326_vm0, %v2910_v14 }
0x1b5f   : > { %3825 = shalt.err (!%p3822_p11)
}
0x1b60   : > { %s3826_s15 = scalar_lea.hbm %s4980_s9, 128  ;;  %s3830_s7 = scalar_lea.hbm %s5028_s5, 256 }
0x1b61   : > { %p3827_p13 = scmp.ne.s32.totalorder %s4980_s9, %s3826_s15  ;;  %p3831_p6 = scmp.lt.u32.totalorder %s4980_s9, %s5028_s5 }
0x1b62   : > { %p3832_p9 = scmp.lt.u32.totalorder %s3830_s7, %s3826_s15  ;;  %p3834_p12 = scmp.lt.u32.totalorder %s3826_s15, %s4980_s9 }
0x1b63   : > { %p3828_p5 = pnand %p3827_p13, %p5045_p1 }
0x1b64   : > { %p3833_p10 = por %p3832_p9, %p3831_p6 }
0x1b65   : > { %p3829_p0 = pneg %p3828_p5 }
0x1b66   : > { %p3835_p2 = por %p3834_p12, %p3833_p10 }
0x1b68   : > { %p3836_p3 = pnand %p3835_p2, %p3829_p0 }
0x1b6a   : > { %3839 = shalt.err (!%p3836_p3)
}
0x1b6b   : > { %3557 = dma.vmem_to_hbm [thread:$0]  (%p5045_p1), %s4982_s10, 128, %s4980_s9, %s2913_s22  }
0x1b6c PF: > { %p3574_p4 = scmp.ge.s32.totalorder %s3882_s21, 2  ;;  %s2938_s8 = sand.u32 1, %s3870_s18  }
0x1b6d   : > { %p5046_p7 = scmp.ne.s32.totalorder %s5033_s29, 0  ;;  %s2939_s30 = scalar_lea.sflag [#allocation4], %s2938_s8 }
0x1b6f   : > { %p3567_p8 = pnand %p3574_p4, %p5046_p7 }
0x1b71   : > { %3865 = dma.done.wait (!%p3567_p8), %s2939_s30, 128  }
0x1b72   : > { %3867 = vsyncadd (!%p3567_p8), %s2939_s30, 4294967168  ;;  %p17_p11 = scmp.ge.s32.totalorder %s3951_s24, 4   ;;  %s5047_s18 = smov %s3874_s19 }
0x1b73   : > { %s5048_s19 = smov %s3878_s20  ;;  %s5049_s20 = smov %s3962_s27 }
0x1b74   : > { %s5050_s21 = smov %s3951_s24  ;;  %19 = sbr.rel (!%p17_p11) target bundleno = 5 (0x5), region = 90 }
0x1b7b   :  { %2944 = vsyncpa [#allocation3], 1 }
0x1b7c   :  { %2946 = vsyncpa [#allocation3 + $0x1], 1 }
0x1b7d   :  { %2947 = vsyncpa [#allocation6], 1 }
0x1b7e   :  { %2948 = vsyncpa [#allocation4], 1 }
0x1b7f   :  { %2950 = vsyncpa [#allocation4 + $0x1], 1 }

</bundles_post_ra>
